<compile_context>
chip_gen: v7x
topology: tpu7x:2x2x1
jax: 0.10.0
libtpu: 0.0.40
codegen_flags: <defaults>
</compile_context>

<pallas_src>
import functools

import jax
import jax.numpy as jnp
from jax import lax
from jax.experimental import pallas as pl
from jax.experimental.pallas import tpu as pltpu


def _log_sigmoid(x):
    # Numerically stable log(sigmoid(x)) = min(x, 0) - log1p(exp(-|x|))
    return jnp.minimum(x, 0.0) - jnp.log1p(jnp.exp(-jnp.abs(x)))


def _sgns_kernel(
    in_ids_ref,      # SMEM [Bp]        int32  (scalar prefetch: center ids)
    ctx_ids_ref,     # SMEM [Bp*C]      int32  (scalar prefetch: pos ++ neg ids, flat)
    in_tab_hbm,      # HBM  [V, Ep]     f32    (in_embed table, lane-padded)
    out_tab_hbm,     # HBM  [V, Ep]     f32    (out_embed table, lane-padded)
    loss_ref,        # VMEM [1, TB]     f32    (output tile)
    in_buf,          # VMEM [TB, Ep]    f32    (scratch: gathered center rows)
    ctx_buf,         # VMEM [TB, C, Ep] f32    (scratch: gathered context rows)
    in_sem,          # DMA semaphore (center-row copies)
    ctx_sem,         # DMA semaphore (context-row copies)
    *, num_pos, tb, num_ctx,
):
    base = pl.program_id(0) * tb

    # ---- Issue ALL row-gather DMAs for this batch tile (they overlap). ----
    @pl.loop(0, tb)
    def _issue(r):
        row = base + r
        in_idx = in_ids_ref[row]
        pltpu.make_async_copy(
            in_tab_hbm.at[pl.ds(in_idx, 1)], in_buf.at[pl.ds(r, 1)], in_sem
        ).start()

        @pl.loop(0, num_ctx)
        def _issue_ctx(c):
            ctx_idx = ctx_ids_ref[row * num_ctx + c]
            pltpu.make_async_copy(
                out_tab_hbm.at[pl.ds(ctx_idx, 1)],
                ctx_buf.at[r, pl.ds(c, 1)],
                ctx_sem,
            ).start()

    # ---- Wait: one wait per started copy, same-sized descriptors. ----
    @pl.loop(0, tb)
    def _wait_in(r):
        pltpu.make_async_copy(
            in_tab_hbm.at[pl.ds(0, 1)], in_buf.at[pl.ds(0, 1)], in_sem
        ).wait()

    @pl.loop(0, tb * num_ctx)
    def _wait_ctx(i):
        pltpu.make_async_copy(
            out_tab_hbm.at[pl.ds(0, 1)], ctx_buf.at[0, pl.ds(0, 1)], ctx_sem
        ).wait()

    # ---- Compute: dots, sign, log-sigmoid, reduce.  O(TB*C*Ep), no V term. ----
    in_emb = in_buf[...]                                     # [TB, Ep]
    ctx_emb = ctx_buf[...]                                   # [TB, C, Ep]
    dots = jnp.sum(ctx_emb * in_emb[:, None, :], axis=-1)    # [TB, C]

    # First `num_pos` context columns are positives (+dot), the rest negatives
    # (-dot): applying the sign to the scalar dot replaces the (-in_emb)
    # broadcast of the original formulation.
    sign = jnp.where(
        lax.broadcasted_iota(jnp.int32, dots.shape, 1) < num_pos, 1.0, -1.0)
    log_sig = _log_sigmoid(dots * sign)                      # [TB, C]

    loss_ref[...] = (-jnp.sum(log_sig, axis=-1))[None, :]    # [1, TB]


def sgns_loss_pallas(in_table, out_table, input_labels, pos_labels, neg_labels):
    """Fused SGNS loss. Tables [V, E] f32 (ideally pre-padded to E%128==0),
    integer labels; returns loss [B] f32."""
    V, E = in_table.shape
    B = input_labels.shape[0]
    P = pos_labels.shape[1]
    N = neg_labels.shape[1]
    C = P + N

    # Lane-pad the embedding dim to a multiple of 128 (zero pad: dots
    # unchanged).  The model pads its tables once at init, so this branch is
    # normally skipped — it only exists for standalone callers.
    Ep = ((E + 127) // 128) * 128
    if Ep != E:
        in_tab = jnp.pad(in_table, ((0, 0), (0, Ep - E)))
        out_tab = jnp.pad(out_table, ((0, 0), (0, Ep - E)))
    else:
        in_tab, out_tab = in_table, out_table

    in_ids = input_labels.astype(jnp.int32)                                  # [B]
    ctx_ids = jnp.concatenate([pos_labels, neg_labels], axis=1).astype(jnp.int32)  # [B, C]

    # Batch tiling: whole (sublane-rounded) batch if small, else 128-row tiles
    # so the (1, TB) output block stores lane-dense.  Padded rows gather row 0
    # (valid) and are sliced off at the end.
    if B <= 128:
        TB = ((B + 7) // 8) * 8
        Bp = TB
    else:
        TB = 128
        Bp = ((B + TB - 1) // TB) * TB
    if Bp != B:
        in_ids = jnp.pad(in_ids, ((0, Bp - B),))
        ctx_ids = jnp.pad(ctx_ids, ((0, Bp - B), (0, 0)))
    ctx_flat = ctx_ids.reshape(Bp * C)    # 1-D for compact SMEM residency

    grid_spec = pltpu.PrefetchScalarGridSpec(
        num_scalar_prefetch=2,
        grid=(Bp // TB,),
        in_specs=[
            pl.BlockSpec(memory_space=pl.ANY),   # in_embed table stays in HBM
            pl.BlockSpec(memory_space=pl.ANY),   # out_embed table stays in HBM
        ],
        out_specs=pl.BlockSpec((1, TB), lambda i, *_: (0, i)),
        scratch_shapes=[
            pltpu.VMEM((TB, Ep), jnp.float32),       # gathered center rows
            pltpu.VMEM((TB, C, Ep), jnp.float32),    # gathered context rows
            pltpu.SemaphoreType.DMA,                 # center-row DMA sem
            pltpu.SemaphoreType.DMA,                 # context-row DMA sem
        ],
    )

    out = pl.pallas_call(
        functools.partial(_sgns_kernel, num_pos=P, tb=TB, num_ctx=C),
        out_shape=jax.ShapeDtypeStruct((1, Bp), jnp.float32),
        grid_spec=grid_spec,
        compiler_params=pltpu.CompilerParams(dimension_semantics=("parallel",)),
    )(in_ids, ctx_flat, in_tab, out_tab)
    return out[0, :B]


class EmbeddingModelPallas:
    """JAX/Pallas port of EmbeddingModel (skip-gram with negative sampling)."""

    def __init__(self, vocab_size, embed_size, key):
        self.vocab_size = vocab_size
        self.embed_size = embed_size
        k_in, k_out = jax.random.split(key)
        # nn.Embedding default init: N(0, 1)
        in_embed = jax.random.normal(k_in, (vocab_size, embed_size), jnp.float32)
        out_embed = jax.random.normal(k_out, (vocab_size, embed_size), jnp.float32)
        # Lane-pad ONCE at init (zero columns leave every dot product unchanged)
        # so the forward pass never re-materializes a padded HBM copy.
        ep = ((embed_size + 127) // 128) * 128
        self.in_embed = jnp.pad(in_embed, ((0, 0), (0, ep - embed_size)))
        self.out_embed = jnp.pad(out_embed, ((0, 0), (0, ep - embed_size)))

    def forward(self, input_labels, pos_labels, neg_labels):
        # Gather + dot + log-sigmoid + reduce all run inside the Pallas kernel.
        return sgns_loss_pallas(self.in_embed, self.out_embed,
                                input_labels, pos_labels, neg_labels)          # [B]

    def input_embedding(self):
        return jax.device_get(self.in_embed[:, :self.embed_size])


def _reference_loss(model, input_labels, pos_labels, neg_labels):
    """Pure-JAX reference mirroring the PyTorch forward, for a sanity check."""
    in_emb = jnp.take(model.in_embed, input_labels, axis=0)
    pos_emb = jnp.take(model.out_embed, pos_labels, axis=0)
    neg_emb = jnp.take(model.out_embed, neg_labels, axis=0)
    pos_dot = jnp.einsum("bpe,be->bp", pos_emb, in_emb)
    neg_dot = jnp.einsum("bne,be->bn", neg_emb, -in_emb)
    log_pos = jnp.sum(jax.nn.log_sigmoid(pos_dot), axis=1)
    log_neg = jnp.sum(jax.nn.log_sigmoid(neg_dot), axis=1)
    return -(log_pos + log_neg)


if __name__ == "__main__":
    key = jax.random.PRNGKey(0)
    k_model, k_in, k_pos, k_neg = jax.random.split(key, 4)

    vocab_size = 64
    embed_size = 32
    batch = 8
    window = 4          # pos: window * 2 = 8
    K = 4               # neg: window * 2 * K = 32

    model = EmbeddingModelPallas(vocab_size, embed_size, k_model)

    input_labels = jax.random.randint(k_in, (batch,), 0, vocab_size, jnp.int32)
    pos_labels = jax.random.randint(k_pos, (batch, window * 2), 0, vocab_size, jnp.int32)
    neg_labels = jax.random.randint(k_neg, (batch, window * 2 * K), 0, vocab_size, jnp.int32)

    loss = model.forward(input_labels, pos_labels, neg_labels)
    loss = jax.block_until_ready(loss)

    ref = _reference_loss(model, input_labels, pos_labels, neg_labels)
    assert loss.shape == (batch,)
    assert jnp.allclose(loss, ref, atol=1e-3, rtol=1e-3), (loss, ref)

    print("KERNEL_OK")
</pallas_src>

<mosaic_0001>
module attributes {stable_mosaic.version = 11 : i64} {
  func.func @_sgns_kernel(%arg0: i32, %arg1: memref<8xi32, #tpu.memory_space<smem>>, %arg2: memref<320xi32, #tpu.memory_space<smem>>, %arg3: memref<64x128xf32, #tpu.memory_space<any>>, %arg4: memref<64x128xf32, #tpu.memory_space<any>>, %arg5: memref<1x8xf32, #tpu.memory_space<vmem>>, %arg6: memref<8x128xf32, #tpu.memory_space<vmem>>, %arg7: memref<8x40x128xf32, #tpu.memory_space<vmem>>, %arg8: memref<!tpu.dma_semaphore, #tpu.memory_space<semaphore_mem>>, %arg9: memref<!tpu.dma_semaphore, #tpu.memory_space<semaphore_mem>>) attributes {dimension_semantics = [#tpu.dimension_semantics<parallel>], iteration_bounds = array<i64: 1>, scalar_prefetch = 2 : i64, scratch_operands = 4 : i64, tpu.core_type = #tpu.core_type<tc>, window_params = [{}, {}, {transform_indices = @transform_2, window_bounds = array<i64: 1, 8>}]} {
    %c8_i32 = arith.constant 8 : i32
    %0 = arith.muli %arg0, %c8_i32 : i32
    %c0_i32 = arith.constant 0 : i32
    %c8_i32_0 = arith.constant 8 : i32
    %1 = arith.addi %c0_i32, %c8_i32_0 : i32
    %c1_i32 = arith.constant 1 : i32
    scf.for %arg10 = %c0_i32 to %1 step %c1_i32  : i32 {
      %c1_i32_20 = arith.constant 1 : i32
      %30 = arith.muli %arg10, %c1_i32_20 : i32
      %c0_i32_21 = arith.constant 0 : i32
      %31 = arith.addi %c0_i32_21, %30 : i32
      %32 = arith.addi %0, %31 : i32
      %33 = arith.index_cast %32 : i32 to index
      %34 = memref.load %arg1[%33] : memref<8xi32, #tpu.memory_space<smem>>
      %c0_i32_22 = arith.constant 0 : i32
      %35 = tpu.memref_slice %arg3[%34, %c0_i32_22] : memref<64x128xf32, #tpu.memory_space<any>> -> memref<1x128xf32, #tpu.memory_space<any>>
      %c0_i32_23 = arith.constant 0 : i32
      %36 = tpu.memref_slice %arg6[%31, %c0_i32_23] : memref<8x128xf32, #tpu.memory_space<vmem>> -> memref<1x128xf32, #tpu.memory_space<vmem>>
      tpu.enqueue_dma source(%35 : memref<1x128xf32, #tpu.memory_space<any>>) target(%36 : memref<1x128xf32, #tpu.memory_space<vmem>>) target_semaphore(%arg8 : memref<!tpu.dma_semaphore, #tpu.memory_space<semaphore_mem>>)
      %c0_i32_24 = arith.constant 0 : i32
      %c40_i32 = arith.constant 40 : i32
      %37 = arith.addi %c0_i32_24, %c40_i32 : i32
      %c1_i32_25 = arith.constant 1 : i32
      scf.for %arg11 = %c0_i32_24 to %37 step %c1_i32_25  : i32 {
        %c1_i32_27 = arith.constant 1 : i32
        %38 = arith.muli %arg11, %c1_i32_27 : i32
        %c0_i32_28 = arith.constant 0 : i32
        %39 = arith.addi %c0_i32_28, %38 : i32
        %c40_i32_29 = arith.constant 40 : i32
        %40 = arith.muli %32, %c40_i32_29 : i32
        %41 = arith.addi %40, %39 : i32
        %42 = arith.index_cast %41 : i32 to index
        %43 = memref.load %arg2[%42] : memref<320xi32, #tpu.memory_space<smem>>
        %c0_i32_30 = arith.constant 0 : i32
        %44 = tpu.memref_slice %arg4[%43, %c0_i32_30] : memref<64x128xf32, #tpu.memory_space<any>> -> memref<1x128xf32, #tpu.memory_space<any>>
        %c0_i32_31 = arith.constant 0 : i32
        %45 = tpu.memref_slice %arg7[%31, %39, %c0_i32_31] : memref<8x40x128xf32, #tpu.memory_space<vmem>> -> memref<1x1x128xf32, #tpu.memory_space<vmem>>
        %46 = tpu.memref_squeeze %45 : memref<1x1x128xf32, #tpu.memory_space<vmem>> -> memref<1x128xf32, #tpu.memory_space<vmem>>
        tpu.enqueue_dma source(%44 : memref<1x128xf32, #tpu.memory_space<any>>) target(%46 : memref<1x128xf32, #tpu.memory_space<vmem>>) target_semaphore(%arg9 : memref<!tpu.dma_semaphore, #tpu.memory_space<semaphore_mem>>)
      }
      %c40_i32_26 = arith.constant 40 : i32
    }
    %c8_i32_1 = arith.constant 8 : i32
    %c0_i32_2 = arith.constant 0 : i32
    %c8_i32_3 = arith.constant 8 : i32
    %2 = arith.addi %c0_i32_2, %c8_i32_3 : i32
    %c1_i32_4 = arith.constant 1 : i32
    scf.for %arg10 = %c0_i32_2 to %2 step %c1_i32_4  : i32 {
      %c0_i32_20 = arith.constant 0 : i32
      %c0_i32_21 = arith.constant 0 : i32
      %30 = tpu.memref_slice %arg3[%c0_i32_20, %c0_i32_21] : memref<64x128xf32, #tpu.memory_space<any>> -> memref<1x128xf32, #tpu.memory_space<any>>
      %c0_i32_22 = arith.constant 0 : i32
      %c0_i32_23 = arith.constant 0 : i32
      %31 = tpu.memref_slice %arg6[%c0_i32_22, %c0_i32_23] : memref<8x128xf32, #tpu.memory_space<vmem>> -> memref<1x128xf32, #tpu.memory_space<vmem>>
      tpu.wait_dma2 semaphore(%arg8 : memref<!tpu.dma_semaphore, #tpu.memory_space<semaphore_mem>>) src(%30 : memref<1x128xf32, #tpu.memory_space<any>>) dst(%31 : memref<1x128xf32, #tpu.memory_space<vmem>>)
    }
    %c0_i32_5 = arith.constant 0 : i32
    %c320_i32 = arith.constant 320 : i32
    %3 = arith.addi %c0_i32_5, %c320_i32 : i32
    %c1_i32_6 = arith.constant 1 : i32
    scf.for %arg10 = %c0_i32_5 to %3 step %c1_i32_6  : i32 {
      %c0_i32_20 = arith.constant 0 : i32
      %c0_i32_21 = arith.constant 0 : i32
      %c0_i32_22 = arith.constant 0 : i32
      %30 = tpu.memref_slice %arg4[%c0_i32_21, %c0_i32_22] : memref<64x128xf32, #tpu.memory_space<any>> -> memref<1x128xf32, #tpu.memory_space<any>>
      %c0_i32_23 = arith.constant 0 : i32
      %c0_i32_24 = arith.constant 0 : i32
      %31 = tpu.memref_slice %arg7[%c0_i32_20, %c0_i32_23, %c0_i32_24] : memref<8x40x128xf32, #tpu.memory_space<vmem>> -> memref<1x1x128xf32, #tpu.memory_space<vmem>>
      %32 = tpu.memref_squeeze %31 : memref<1x1x128xf32, #tpu.memory_space<vmem>> -> memref<1x128xf32, #tpu.memory_space<vmem>>
      tpu.wait_dma2 semaphore(%arg9 : memref<!tpu.dma_semaphore, #tpu.memory_space<semaphore_mem>>) src(%30 : memref<1x128xf32, #tpu.memory_space<any>>) dst(%32 : memref<1x128xf32, #tpu.memory_space<vmem>>)
    }
    %c0 = arith.constant 0 : index
    %c0_7 = arith.constant 0 : index
    %4 = vector.load %arg6[%c0, %c0_7] : memref<8x128xf32, #tpu.memory_space<vmem>>, vector<8x128xf32>
    %c0_8 = arith.constant 0 : index
    %c0_9 = arith.constant 0 : index
    %c0_10 = arith.constant 0 : index
    %5 = vector.load %arg7[%c0_8, %c0_9, %c0_10] : memref<8x40x128xf32, #tpu.memory_space<vmem>>, vector<8x40x128xf32>
    %6 = vector.shape_cast %4 : vector<8x128xf32> to vector<8x1x128xf32>
    %7 = vector.broadcast %6 : vector<8x1x128xf32> to vector<8x40x128xf32>
    %8 = arith.mulf %5, %7 : vector<8x40x128xf32>
    %cst = arith.constant dense<0.000000e+00> : vector<8x40xf32>
    %9 = vector.multi_reduction <add>, %8, %cst [2] : vector<8x40x128xf32> to vector<8x40xf32>
    %10 = tpu.iota {dimensions = array<i32: 1>} : vector<8x40xi32>
    %c8_i32_11 = arith.constant 8 : i32
    %11 = vector.broadcast %c8_i32_11 : i32 to vector<8x40xi32>
    %12 = arith.cmpi slt, %10, %11 : vector<8x40xi32>
    %cst_12 = arith.constant 1.000000e+00 : f32
    %cst_13 = arith.constant -1.000000e+00 : f32
    %13 = vector.broadcast %cst_12 : f32 to vector<8x40xf32>
    %14 = vector.broadcast %cst_13 : f32 to vector<8x40xf32>
    %15 = arith.select %12, %13, %14 : vector<8x40xi1>, vector<8x40xf32>
    %16 = arith.mulf %9, %15 : vector<8x40xf32>
    %cst_14 = arith.constant 0.000000e+00 : f32
    %17 = vector.broadcast %cst_14 : f32 to vector<8x40xf32>
    %18 = arith.minimumf %16, %17 : vector<8x40xf32>
    %19 = math.absf %16 : vector<8x40xf32>
    %cst_15 = arith.constant 0.000000e+00 : f32
    %20 = vector.broadcast %cst_15 : f32 to vector<8x40xf32>
    %21 = arith.subf %20, %19 : vector<8x40xf32>
    %22 = math.exp %21 : vector<8x40xf32>
    %23 = math.log1p %22 : vector<8x40xf32>
    %24 = arith.subf %18, %23 : vector<8x40xf32>
    %cst_16 = arith.constant dense<0.000000e+00> : vector<8xf32>
    %25 = vector.multi_reduction <add>, %24, %cst_16 [1] : vector<8x40xf32> to vector<8xf32>
    %cst_17 = arith.constant 0.000000e+00 : f32
    %26 = vector.broadcast %cst_17 : f32 to vector<8xf32>
    %27 = arith.subf %26, %25 : vector<8xf32>
    %28 = vector.shape_cast %27 : vector<8xf32> to vector<1x8xf32>
    %c0_18 = arith.constant 0 : index
    %c0_19 = arith.constant 0 : index
    %29 = vector.load %arg5[%c0_18, %c0_19] : memref<1x8xf32, #tpu.memory_space<vmem>>, vector<1x8xf32>
    tpu.vector_store %arg5[%c0_18, %c0_19], %28 {strides = array<i32>} : memref<1x8xf32, #tpu.memory_space<vmem>>, vector<1x8xf32>,
    return
  }
  func.func @transform_2(%arg0: i32, %arg1: memref<8xi32, #tpu.memory_space<smem>>, %arg2: memref<320xi32, #tpu.memory_space<smem>>) -> (i32, i32) {
    %c0_i32 = arith.constant 0 : i32
    %c0_i32_0 = arith.constant 0 : i32
    return %c0_i32, %arg0 : i32, i32
  }
}

</mosaic_0001>

<bundles_post_ra>
// kernel: tpu_custom_call.1
= control target key start
LH: loop header
LB: loop body
LE: loop exit
PB: predicated region body
PF: predicated region fallthrough
CT: control target
= control target key end

     0   :  { %s2716_s0 = inlined_call_operand.hbm [shape: s32[8], index: 0, kind: input, shape index: {}]   ;;  %s2717_s2 = inlined_call_operand.hbm [shape: f32[64,128], index: 2, kind: input, shape index: {}]   ;;  %s2718_s3 = inlined_call_operand.hbm [shape: f32[64,128], index: 3, kind: input, shape index: {}]   ;;  %s2719_s4 = inlined_call_operand.hbm [shape: f32[1,8], index: 4, kind: output, shape index: {}]   ;;  %s2720_s1 = inlined_call_operand.hbm [shape: s32[320], index: 1, kind: input, shape index: {}]  }
   0x1   :  { %s1649_s17 = scalar_lea.hbm %s2716_s0, 16 }
   0x2   :  { %p1650_p0 = scmp.ne.s32.totalorder %s2716_s0, %s1649_s17  ;;  %p1653_p1 = scmp.lt.u32.totalorder %s1649_s17, %s2716_s0 }
   0x4   :  { %p1655_p2 = pnand %p1653_p1, %p1650_p0 }
   0x6   :  { %1658 = shalt.err (!%p1655_p2)  }
   0x7   :  { %s1779_s22 = smov [#allocation7]   ;;  %s1659_s27 = scalar_lea.hbm %s2720_s1, 48 }
   0x8   :  { %10 = dma.hbm_to_smem %s2716_s0, 16, %s1779_s22, [#allocation6] }
   0x9   :  { %p1660_p3 = scmp.ne.s32.totalorder %s2720_s1, %s1659_s27  ;;  %s1661_s6 = scalar_lea.hbm %s2720_s1, 64 }
   0xa   :  { %p1662_p4 = scmp.lt.u32.totalorder %s1661_s6, %s1659_s27  ;;  %p1663_p5 = scmp.lt.u32.totalorder %s1659_s27, %s2720_s1 }
   0xc   :  { %p1664_p6 = por %p1663_p5, %p1662_p4 }
   0xe   :  { %p1665_p7 = pnand %p1664_p6, %p1660_p3 }
  0x10   :  { %1668 = shalt.err (!%p1665_p7)  }
  0x11   :  { %s1780_s0 = smov [#allocation8]  }
  0x12   :  { %12 = dma.hbm_to_smem %s2720_s1, 48, %s1780_s0, [#allocation6] }
  0x13   :  { %1755 = dma.done.wait [#allocation6], 64 }
  0x14   :  { %1756 = vsyncadd [#allocation6], 4294967232 }
  0x15   :  { %14 = sfence }
  0x16   :  { %15 = vsyncpa [#allocation10], 0  ;;  %s1839_s11 = smov 0  }
  0x17 LB: > { %s24_s12 = sld [smem:[#allocation7 + %s1765_s11]]  ;;  %s27_s13 = scalar_lea.vmem [#allocation2], %s1765_s11  ;;  %s1765_s11 = sphi %s1839_s11, %s22_s11  }
  0x18   : > { %s35_s14 = sshll.u32 %s27_s13, 4  ;;  %s1671_s21 = scalar_lea.hbm %s2717_s2, 1024  ;;  %s36_s14 = int_to_ptr.vmem [resolvable:$true] %s35_s14 }
  0x1d   : > { %s1444_s15 = sshll.u32 %s24_s12, 4 }
  0x1e   : > { %s26_s17 = scalar_lea.hbm %s2717_s2, %s1444_s15 }
  0x1f   : > { %s1669_s18 = scalar_lea.hbm %s26_s17, 16  ;;  %p1672_p9 = scmp.lt.u32.totalorder %s26_s17, %s2717_s2 }
  0x20   : > { %p1670_p8 = scmp.ne.s32.totalorder %s26_s17, %s1669_s18  ;;  %p1673_p10 = scmp.lt.u32.totalorder %s1671_s21, %s1669_s18 }
  0x21   : > { %p1675_p12 = scmp.lt.u32.totalorder %s1669_s18, %s26_s17 }
  0x22   : > { %p1674_p11 = por %p1673_p10, %p1672_p9 }
  0x24   : > { %p1676_p13 = por %p1675_p12, %p1674_p11 }
  0x26   : > { %p1677_p0 = pnand %p1676_p13, %p1670_p8 }
  0x28   : > { %1680 = shalt.err (!%p1677_p0)  }
  0x29   : > { %s1681_s24 = scalar_lea.vmem %s36_s14, 16  ;;  %s1781_s25 = smov [#allocation2]  }
  0x2a   : > { %p1682_p1 = scmp.ne.s32.totalorder %s36_s14, %s1681_s24  ;;  %s1683_s26 = sshll.u32 %s1781_s25, 4  ;;  %s1684_s26 = int_to_ptr.vmem [resolvable:$false] %s1683_s26 }
  0x2b   : > { %s1685_s27 = scalar_lea.vmem %s1684_s26, 128  ;;  %p1686_p2 = scmp.lt.s32.totalorder %s36_s14, %s1684_s26 }
  0x2c   : > { %p1687_p3 = scmp.lt.s32.totalorder %s1685_s27, %s1681_s24 }
  0x2e   : > { %p1688_p4 = por %p1687_p3, %p1686_p2 }
  0x30   : > { %p1689_p5 = pnand %p1688_p4, %p1682_p1 }
  0x32   : > { %1692 = shalt.err (!%p1689_p5)  }
  0x33   : > { %38 = dma.hbm_to_vmem [thread:$0]  %s26_s17, 16, %s36_s14, [#allocation4] }
  0x34   : > { %s1855_s28 = smov 0  }
  0x35 LB: >> { %s45_s29 = smul.u32 40, %s1765_s11  ;;  %s1695_s15 = scalar_lea.hbm %s2718_s3, 1024  ;;  %s1769_s28 = sphi %s1855_s28, %s44_s28  }
  0x37   : >> { %s46_s30 = sadd.s32 %s1769_s28, %s45_s29 }
  0x38   : >> { %s47_s5 = sld [smem:[#allocation8 + %s46_s30]]  ;;  %s52_s6 = scalar_lea.vmem [#allocation3], %s46_s30 }
  0x39   : >> { %s60_s7 = sshll.u32 %s52_s6, 4  ;;  %s61_s7 = int_to_ptr.vmem [resolvable:$true] %s60_s7 }
  0x3e   : >> { %s1445_s8 = sshll.u32 %s47_s5, 4 }
  0x3f   : >> { %s49_s10 = scalar_lea.hbm %s2718_s3, %s1445_s8 }
  0x40   : >> { %s1693_s12 = scalar_lea.hbm %s49_s10, 16  ;;  %p1696_p7 = scmp.lt.u32.totalorder %s49_s10, %s2718_s3 }
  0x41   : >> { %p1694_p6 = scmp.ne.s32.totalorder %s49_s10, %s1693_s12  ;;  %p1697_p8 = scmp.lt.u32.totalorder %s1695_s15, %s1693_s12 }
  0x42   : >> { %p1699_p10 = scmp.lt.u32.totalorder %s1693_s12, %s49_s10 }
  0x43   : >> { %p1698_p9 = por %p1697_p8, %p1696_p7 }
  0x45   : >> { %p1700_p11 = por %p1699_p10, %p1698_p9 }
  0x47   : >> { %p1701_p12 = pnand %p1700_p11, %p1694_p6 }
  0x49   : >> { %1704 = shalt.err (!%p1701_p12)  }
  0x4a   : >> { %s1705_s17 = scalar_lea.vmem %s61_s7, 16  ;;  %s1782_s18 = smov [#allocation3]  }
  0x4b   : >> { %p1706_p13 = scmp.ne.s32.totalorder %s61_s7, %s1705_s17  ;;  %s1707_s19 = sshll.u32 %s1782_s18, 4  ;;  %s1708_s19 = int_to_ptr.vmem [resolvable:$false] %s1707_s19 }
  0x4c   : >> { %s1709_s20 = scalar_lea.vmem %s1708_s19, 5120  ;;  %p1710_p0 = scmp.lt.s32.totalorder %s61_s7, %s1708_s19 }
  0x4d   : >> { %p1711_p1 = scmp.lt.s32.totalorder %s1709_s20, %s1705_s17 }
  0x4f   : >> { %p1712_p2 = por %p1711_p1, %p1710_p0 }
  0x51   : >> { %p1713_p3 = pnand %p1712_p2, %p1706_p13 }
  0x53   : >> { %1716 = shalt.err (!%p1713_p3)  }
  0x54   : >> { %63 = dma.hbm_to_vmem [thread:$0]  %s49_s10, 16, %s61_s7, [#allocation5] }
  0x55   : >> { %s44_s28 = sadd.s32 1, %s1769_s28  }
  0x56   : >> { %p41_p4 = scmp.ge.s32.totalorder %s44_s28, 40  }
  0x57   : > { %s22_s11 = sadd.s32 (%p41_p4), 1, %s1765_s11  }
  0x58   : > { %43 = sbr.rel (!%p41_p4) target bundleno = 53 (0x35), region = 60  ;;  %p19_p5 = scmp.ge.s32.totalorder (%p41_p4), %s22_s11, 8  }
  0x5f   :  { %21 = sbr.rel (!%p19_p5) target bundleno = 23 (0x17), region = 71  ;;  %s1771_s21 = smov (%p19_p5), 0  }
  0x66 LB: > { %1757 = dma.done.wait [#allocation4], 16  ;;  %s1773_s21 = sphi %s1771_s21, %s69_s21  }
  0x67   : > { %1758 = vsyncadd [#allocation4], 4294967280  ;;  %s69_s21 = sadd.s32 1, %s1773_s21  }
  0x68   : > { %p66_p6 = scmp.ge.s32.totalorder %s69_s21, 8  }
  0x69   :  { %s1775_s22 = smov (%p66_p6), 0  }
  0x6a   :  { %68 = sbr.rel (!%p66_p6) target bundleno = 102 (0x66), region = 82 }
  0x71 LB: > { %1759 = dma.done.wait [#allocation5], 16  ;;  %s1777_s22 = sphi %s1775_s22, %s78_s22  }
  0x72   : > { %1760 = vsyncadd [#allocation5], 4294967280  ;;  %s78_s22 = sadd.s32 1, %s1777_s22  }
  0x73   : > { %p75_p7 = scmp.ge.s32.totalorder %s78_s22, 320  }
  0x74   :  { %v128_v0 = vlaneseq (%p75_p7)  ;;  %v1783_v1 = vmov (%p75_p7), 1966171168   ;;  %v82_v5 = vld [vmem:[#allocation2] sm:$0xff] (%p75_p7)  ;;  %v85_v11 = vld [vmem:[#allocation3 + $0x10] sm:$0xff] (%p75_p7)  ;;  %v83_v12 = vld [vmem:[#allocation3] sm:$0xff] (%p75_p7)  ;;  %s1786_s2 = smov (%p75_p7), [#allocation9]  }
  0x75   :  { %77 = sbr.rel (!%p75_p7) target bundleno = 113 (0x71), region = 93  ;;  %v126_v2 = vunpack.c.l.s4 (%p75_p7), %v1783_v1  ;;  %v86_v15 = vld [vmem:[#allocation3 + $0x18] sm:$0xff] (%p75_p7)  ;;  %v84_v16 = vld [vmem:[#allocation3 + $0x8] sm:$0xff] (%p75_p7)  ;;  %v87_v22 = vld [vmem:[#allocation3 + $0x20] sm:$0xff] (%p75_p7)  ;;  %v124_v34 = vcombine.high (%p75_p7), %v82_v5, %v82_v5  ;;  %s1396_s3 = sshll.u32 (%p75_p7), %s1786_s2, 4  ;;  %s1397_s3 = int_to_ptr.vmem [resolvable:$true] %s1396_s3 }
  0x76   :  { %v1878_v3 = vshrl.u32 (%p75_p7), %v128_v0, 7  ;;  %v88_v23 = vld [vmem:[#allocation3 + $0x28] sm:$0xff] (%p75_p7)  ;;  %v89_v27 = vld [vmem:[#allocation3 + $0x30] sm:$0xff] (%p75_p7)  ;;  %v90_v28 = vld [vmem:[#allocation3 + $0x38] sm:$0xff] (%p75_p7)  ;;  %s1717_s11 = scalar_lea.vmem (%p75_p7), %s1397_s3, 16  ;;  %s1721_s23 = scalar_lea.vmem (%p75_p7), %s1397_s3, 32 }
  0x77   :  { %v127_v4 = vunpack.c.0.s8 (%p75_p7), %v126_v2  ;;  %v93_v32 = vld [vmem:[#allocation3 + $0x50] sm:$0xff] (%p75_p7)  ;;  %v94_v33 = vld [vmem:[#allocation3 + $0x58] sm:$0xff] (%p75_p7)  ;;  %v91_v38 = vld [vmem:[#allocation3 + $0x40] sm:$0xff] (%p75_p7)  ;;  %p1718_p8 = scmp.ne.s32.totalorder (%p75_p7), %s1397_s3, %s1717_s11  ;;  %p1722_p9 = scmp.lt.s32.totalorder (%p75_p7), %s1397_s3, %s1397_s3 }
  0x78   :  { %2729 = vst [vmem:[#allocation21_spill] sm:$0xff] (%p75_p7), %v1878_v3  ;;  %v1885_v8 = vsub.s32 (%p75_p7), 0, %v1878_v3  ;;  %v95_v39 = vld [vmem:[#allocation3 + $0x60] sm:$0xff] (%p75_p7)  ;;  %v98_v45 = vld [vmem:[#allocation3 + $0x78] sm:$0xff] (%p75_p7)  ;;  %v96_v49 = vld [vmem:[#allocation3 + $0x68] sm:$0xff] (%p75_p7)  ;;  %p1723_p10 = scmp.lt.s32.totalorder (%p75_p7), %s1721_s23, %s1717_s11 }
  0x79   :  { %v1881_v6 = vsub.s32 (%p75_p7), %v127_v4, %v1878_v3  ;;  %v99_v44 = vld [vmem:[#allocation3 + $0x80] sm:$0xff] (%p75_p7)  ;;  %v92_v50 = vld [vmem:[#allocation3 + $0x48] sm:$0xff] (%p75_p7)  ;;  %v97_v60 = vld [vmem:[#allocation3 + $0x70] sm:$0xff] (%p75_p7) }
  0x7a   :  { %v100_v54 = vld [vmem:[#allocation3 + $0x88] sm:$0xff] (%p75_p7)  ;;  %v103_v55 = vld [vmem:[#allocation3 + $0xa0] sm:$0xff] (%p75_p7)  ;;  %v101_v1 = vld [vmem:[#allocation3 + $0x90] sm:$0xff] (%p75_p7)  ;;  %p1724_p11 = por (%p75_p7), %p1723_p10, %p1722_p9 }
  0x7b   :  { %v131_v7 = vrot.slane (%p75_p7), %v82_v5, %v1881_v6  ;;  %v138_v40 = vrot.slane (%p75_p7), %v124_v34, %v1881_v6  ;;  %v104_v59 = vld [vmem:[#allocation3 + $0xa8] sm:$0xff] (%p75_p7)  ;;  %v105_v2 = vld [vmem:[#allocation3 + $0xb0] sm:$0xff] (%p75_p7) }
  0x7c   :  { %p1725_p12 = pnand %p1724_p11, %p1718_p8 }
  0x7d   :  { %v147_v9 = vrot.slane %v131_v7, %v1881_v6  ;;  %v139_v10 = vcombine.high %v131_v7, %v131_v7  ;;  %v154_v48 = vrot.slane %v138_v40, %v1881_v6  ;;  %v140_v58 = vcombine.high %v138_v40, %v138_v40  ;;  %v117_v40 = vld [vmem:[#allocation3 + $0x110] sm:$0xff] }
  0x7f   :  { %v176_v13 = vrot.slane %v147_v9, %v1885_v8  ;;  %v161_v14 = vrot.slane %v139_v10, %v1881_v6  ;;  %v169_v26 = vcombine.high %v147_v9, %v147_v9  ;;  %v192_v53 = vrot.slane %v154_v48, %v1885_v8  ;;  %v109_v9 = vld [vmem:[#allocation3 + $0xd0] sm:$0xff]  ;;  %v108_v10 = vld [vmem:[#allocation3 + $0xc8] sm:$0xff] }
  0x80   :  { %v168_v63 = vrot.slane %v140_v58, %v1881_v6 }
  0x81   :  { %v215_v17 = vmul.f32 %v176_v13, %v85_v11  ;;  %v213_v18 = vmul.f32 %v176_v13, %v83_v12  ;;  %v216_v19 = vmul.f32 %v176_v13, %v86_v15  ;;  %v214_v20 = vmul.f32 %v176_v13, %v84_v16  ;;  %v102_v15 = vld [vmem:[#allocation3 + $0x98] sm:$0xff] }
  0x82   :  { %v180_v21 = vrot.slane %v161_v14, %v1885_v8  ;;  %v217_v24 = vmul.f32 %v176_v13, %v87_v22  ;;  %v184_v31 = vrot.slane %v169_v26, %v1885_v8  ;;  %v171_v37 = vcombine.high %v161_v14, %v161_v14  ;;  %v106_v14 = vld [vmem:[#allocation3 + $0xb8] sm:$0xff]  ;;  %v107_v22 = vld [vmem:[#allocation3 + $0xc0] sm:$0xff] }
  0x83   :  { %257 = vadd.xlane.f32.xlu1 %v215_v17  ;;  %253 = vadd.xlane.f32.xlu0 %v213_v18  ;;  %v233_v57 = vmul.f32 %v192_v53, %v103_v55  ;;  %v234_v61 = vmul.f32 %v192_v53, %v104_v59  ;;  %v235_v5 = vmul.f32 %v192_v53, %v105_v2  ;;  %v113_v18 = vld [vmem:[#allocation3 + $0xf0] sm:$0xff] }
  0x84   :  { %v218_v25 = vmul.f32 %v180_v21, %v88_v23  ;;  %v219_v29 = vmul.f32 %v180_v21, %v89_v27  ;;  %v220_v30 = vmul.f32 %v180_v21, %v90_v28  ;;  %v223_v35 = vmul.f32 %v184_v31, %v93_v32  ;;  %v114_v23 = vld [vmem:[#allocation3 + $0xf8] sm:$0xff]  ;;  %v115_v27 = vld [vmem:[#allocation3 + $0x100] sm:$0xff] }
  0x85   :  { %v224_v36 = vmul.f32 %v184_v31, %v94_v33  ;;  %v221_v41 = vmul.f32 %v180_v21, %v91_v38  ;;  %v225_v42 = vmul.f32 %v184_v31, %v95_v39  ;;  %v188_v43 = vrot.slane %v171_v37, %v1885_v8  ;;  %v111_v28 = vld [vmem:[#allocation3 + $0xe0] sm:$0xff]  ;;  %v118_v33 = vld [vmem:[#allocation3 + $0x118] sm:$0xff]  ;;  %v112_v37 = vld [vmem:[#allocation3 + $0xe8] sm:$0xff] }
  0x86   :  { %v226_v51 = vmul.f32 %v184_v31, %v96_v49  ;;  %v222_v52 = vmul.f32 %v180_v21, %v92_v50  ;;  %v227_v62 = vmul.f32 %v184_v31, %v97_v60  ;;  %v196_v7 = vrot.slane %v168_v63, %v1885_v8  ;;  %v119_v32 = vld [vmem:[#allocation3 + $0x120] sm:$0xff] }
  0x87   :  { %259 = vadd.xlane.f32.xlu1 %v216_v19  ;;  %255 = vadd.xlane.f32.xlu0 %v214_v20  ;;  %v229_v46 = vmul.f32 %v188_v43, %v99_v44  ;;  %v228_v47 = vmul.f32 %v188_v43, %v98_v45  ;;  %v230_v56 = vmul.f32 %v188_v43, %v100_v54  ;;  %v110_v19 = vld [vmem:[#allocation3 + $0xd8] sm:$0xff]  ;;  %v1785_v50 = vmov 0  }
  0x88   :  { %v231_v4 = vmul.f32 %v188_v43, %v101_v1  ;;  %v239_v11 = vmul.f32 %v196_v7, %v109_v9  ;;  %v238_v12 = vmul.f32 %v196_v7, %v108_v10  ;;  %v170_v13 = vcombine.high %v154_v48, %v154_v48  ;;  %v122_v44 = vld [vmem:[#allocation3 + $0x138] sm:$0xff]  ;;  %1486 = vset.pattern.permute.xlu1 %v1785_v50 }
  0x89   :  { %v236_v6 = vmul.f32 %v192_v53, %v106_v14  ;;  %v232_v16 = vmul.f32 %v188_v43, %v102_v15  ;;  %v240_v21 = vmul.f32 %v196_v7, %v110_v19  ;;  %v172_v26 = vcombine.high %v168_v63, %v168_v63  ;;  %1487 = vset.pattern.permute.xlu0 %v1785_v50 }
  0x8a   :  { %v200_v17 = vrot.slane %v170_v13, %v1885_v8  ;;  %v242_v39 = vmul.f32 %v196_v7, %v112_v37  ;;  %v1784_v48 = vmov -1.0  }
  0x8b   :  { %261 = vadd.xlane.f32.xlu0 %v217_v24  ;;  %263 = vadd.xlane.f32.xlu1 %v218_v25  ;;  %v237_v24 = vmul.f32 %v192_v53, %v107_v22  ;;  %v204_v31 = vrot.slane %v172_v26, %v1885_v8  ;;  %v121_v8 = vld [vmem:[#allocation3 + $0x130] sm:$0xff] }
  0x8c   :  { %v243_v20 = vmul.f32 %v200_v17, %v113_v18  ;;  %v244_v25 = vmul.f32 %v200_v17, %v114_v23 }
  0x8d   :  { %v249_v34 = vmul.f32 %v204_v31, %v119_v32  ;;  %v252_v45 = vmul.f32 %v204_v31, %v122_v44 }
  0x8f   :  { %265 = vadd.xlane.f32.xlu0 %v219_v29  ;;  %267 = vadd.xlane.f32.xlu1 %v220_v30  ;;  %v245_v29 = vmul.f32 %v200_v17, %v115_v27  ;;  %v241_v30 = vmul.f32 %v196_v7, %v111_v28 }
  0x93   :  { %273 = vadd.xlane.f32.xlu0 %v223_v35  ;;  %275 = vadd.xlane.f32.xlu1 %v224_v36  ;;  %v248_v35 = vmul.f32 %v204_v31, %v118_v33  ;;  %v116_v36 = vld [vmem:[#allocation3 + $0x108] sm:$0xff] }
  0x94   :  { %v246_v38 = vmul.f32 %v200_v17, %v116_v36 }
  0x97   :  { %269 = vadd.xlane.f32.xlu0 %v221_v41  ;;  %277 = vadd.xlane.f32.xlu1 %v225_v42  ;;  %v120_v41 = vld [vmem:[#allocation3 + $0x128] sm:$0xff]  ;;  %v247_v42 = vmul.f32 %v200_v17, %v117_v40 }
  0x98   :  { %v250_v43 = vmul.f32 %v204_v31, %v120_v41 }
  0x9b   :  { %285 = vadd.xlane.f32.xlu1 %v229_v46  ;;  %283 = vadd.xlane.f32.xlu0 %v228_v47  ;;  %v251_v46 = vmul.f32 %v204_v31, %v121_v8  ;;  %v1901_v47 = vand.u32 127, %v128_v0 }
  0x9d   :  { %2730 = vst [vmem:[#allocation22_spill] sm:$0xff] %v1901_v47  ;;  %vm335_vm0 = vcmp.lt.s32.totalorder %v1901_v47, 8 }
  0x9e   :  { %v336_v49 = vsel %vm335_vm0, 1.0, %v1784_v48 }
  0x9f   :  { %279 = vadd.xlane.f32.xlu1 %v226_v51  ;;  %271 = vadd.xlane.f32.xlu0 %v222_v52 }
  0xa3   :  { %287 = vadd.xlane.f32.xlu0 %v230_v56  ;;  %293 = vadd.xlane.f32.xlu1 %v233_v57 }
  0xa7   :  { %295 = vadd.xlane.f32.xlu0 %v234_v61  ;;  %281 = vadd.xlane.f32.xlu1 %v227_v62 }
  0xab   :  { %289 = vadd.xlane.f32.xlu0 %v231_v4  ;;  %297 = vadd.xlane.f32.xlu1 %v235_v5 }
  0xaf   :  { %305 = vadd.xlane.f32.xlu1 %v239_v11  ;;  %303 = vadd.xlane.f32.xlu0 %v238_v12 }
  0xb3   :  { %299 = vadd.xlane.f32.xlu1 %v236_v6  ;;  %291 = vadd.xlane.f32.xlu0 %v232_v16 }
  0xb7   :  { %313 = vadd.xlane.f32.xlu1 %v243_v20  ;;  %307 = vadd.xlane.f32.xlu0 %v240_v21 }
  0xbb   :  { %301 = vadd.xlane.f32.xlu1 %v237_v24  ;;  %315 = vadd.xlane.f32.xlu0 %v244_v25 }
  0xbf   :  { %317 = vadd.xlane.f32.xlu1 %v245_v29  ;;  %309 = vadd.xlane.f32.xlu0 %v241_v30 }
  0xc3   :  { %325 = vadd.xlane.f32.xlu1 %v249_v34  ;;  %323 = vadd.xlane.f32.xlu0 %v248_v35 }
  0xc7   :  { %319 = vadd.xlane.f32.xlu1 %v246_v38  ;;  %311 = vadd.xlane.f32.xlu0 %v242_v39 }
  0xcb   :  { %321 = vadd.xlane.f32.xlu1 %v247_v42  ;;  %327 = vadd.xlane.f32.xlu0 %v250_v43 }
  0xcf   :  { %331 = vadd.xlane.f32.xlu1 %v252_v45  ;;  %329 = vadd.xlane.f32.xlu0 %v251_v46 }
  0xe0   :  { %343 = vbcast.lane.b32.xlu1 %v336_v49, 264 }
  0xe4   :  { %347 = vbcast.lane.b32.xlu1 %v336_v49, 272 }
  0xe5   :  { %339 = vbcast.lane.b32.xlu0 %v336_v49, 256 }
  0xe8   :  { %351 = vbcast.lane.b32.xlu1 %v336_v49, 280 }
  0xe9   :  { %355 = vbcast.lane.b32.xlu0 %v336_v49, 288 }
 0x110   :  { %v258_v51 = vpop.xlane.xlu1 %257  ;;  %v254_v52 = vpop.xlane.xlu0 %253 }
 0x114   :  { %v1904_v53 = vpop.xlane.xlu1 %259  ;;  %v256_v54 = vpop.xlane.xlu0 %255 }
 0x118   :  { %v262_v55 = vpop.xlane.xlu0 %261  ;;  %v1906_v0 = vpop.xlane.xlu1 %263 }
 0x11c   :  { %v266_v56 = vpop.xlane.xlu0 %265  ;;  %v1908_v57 = vpop.xlane.xlu1 %267 }
 0x120   :  { %v274_v58 = vpop.xlane.xlu0 %273  ;;  %v1910_v59 = vpop.xlane.xlu1 %275 }
 0x124   :  { %v1912_v60 = vpop.xlane.xlu0 %269  ;;  %v1914_v61 = vpop.xlane.xlu1 %277 }
 0x128   :  { %v1916_v62 = vpop.xlane.xlu1 %285  ;;  %v1918_v63 = vpop.xlane.xlu0 %283 }
 0x129   :  { %2731 = vst [vmem:[#allocation23_spill] sm:$0xff] %v1916_v62  ;;  %2732 = vst [vmem:[#allocation24_spill] sm:$0xff] %v1918_v63 }
 0x12c   :  { %v1920_v1 = vpop.xlane.xlu1 %279  ;;  %v1922_v2 = vpop.xlane.xlu0 %271 }
 0x12d   :  { %2733 = vst [vmem:[#allocation25_spill] sm:$0xff] %v1920_v1 }
 0x130   :  { %v1924_v4 = vpop.xlane.xlu0 %287  ;;  %v294_v5 = vpop.xlane.xlu1 %293 }
 0x131   :  { %2734 = vst [vmem:[#allocation26_spill] sm:$0xff] %v1924_v4 }
 0x134   :  { %v296_v7 = vpop.xlane.xlu0 %295  ;;  %v1926_v9 = vpop.xlane.xlu1 %281 }
 0x135   :  { %2735 = vst [vmem:[#allocation27_spill] sm:$0xff] %v1926_v9 }
 0x138   :  { %v1928_v10 = vpop.xlane.xlu0 %289  ;;  %v298_v11 = vpop.xlane.xlu1 %297 }
 0x139   :  { %2736 = vst [vmem:[#allocation28_spill] sm:$0xff] %v1928_v10 }
 0x13c   :  { %v1930_v12 = vpop.xlane.xlu1 %305  ;;  %v1932_v13 = vpop.xlane.xlu0 %303 }
 0x13d   :  { %2737 = vst [vmem:[#allocation29_spill] sm:$0xff] %v1930_v12 }
 0x140   :  { %v300_v14 = vpop.xlane.xlu1 %299  ;;  %v1934_v15 = vpop.xlane.xlu0 %291 }
 0x141   :  { %2738 = vst [vmem:[#allocation30_spill] sm:$0xff] %v1934_v15 }
 0x144   :  { %v1936_v6 = vpop.xlane.xlu1 %313  ;;  %v1938_v16 = vpop.xlane.xlu0 %307 }
 0x145   :  { %2739 = vst [vmem:[#allocation31_spill] sm:$0xff] %v1936_v6 }
 0x148   :  { %v1940_v17 = vpop.xlane.xlu1 %301  ;;  %v1942_v18 = vpop.xlane.xlu0 %315 }
 0x14c   :  { %v1944_v19 = vpop.xlane.xlu1 %317  ;;  %v1946_v20 = vpop.xlane.xlu0 %309 }
 0x14d   :  { %2740 = vst [vmem:[#allocation32_spill] sm:$0xff] %v1944_v19 }
 0x150   :  { %v1948_v21 = vpop.xlane.xlu1 %325  ;;  %v1950_v22 = vpop.xlane.xlu0 %323 }
 0x151   :  { %2741 = vst [vmem:[#allocation33_spill] sm:$0xff] %v1948_v21  ;;  %2742 = vst [vmem:[#allocation34_spill] sm:$0xff] %v1950_v22 }
 0x154   :  { %v1952_v23 = vpop.xlane.xlu1 %319  ;;  %v1954_v24 = vpop.xlane.xlu0 %311 }
 0x155   :  { %2743 = vst [vmem:[#allocation35_spill] sm:$0xff] %v1952_v23  ;;  %2744 = vst [vmem:[#allocation36_spill] sm:$0xff] %v1954_v24 }
 0x158   :  { %v1956_v25 = vpop.xlane.xlu1 %321  ;;  %v1958_v26 = vpop.xlane.xlu0 %327 }
 0x159   :  { %2745 = vst [vmem:[#allocation37_spill] sm:$0xff] %v1956_v25  ;;  %2746 = vst [vmem:[#allocation38_spill] sm:$0xff] %v1958_v26 }
 0x15c   :  { %v1960_v27 = vpop.xlane.xlu1 %331  ;;  %v1962_v28 = vpop.xlane.xlu0 %329 }
 0x15d   :  { %2747 = vst [vmem:[#allocation39_spill] sm:$0xff] %v1960_v27  ;;  %2748 = vst [vmem:[#allocation40_spill] sm:$0xff] %v1962_v28 }
 0x160   :  { %v1964_v29 = vpop.permute.xlu1 %343  ;;  %v1966_v30 = vpop.permute.xlu0 %339 }
 0x161   :  { %2749 = vst [vmem:[#allocation41_spill] sm:$0xff] %v1966_v30  ;;  %v1969_v31 = vmul.f32 %v1964_v29, %v256_v54  ;;  %v1972_v32 = vmul.f32 %v1966_v30, %v254_v52  ;;  %v1975_v33 = vmul.f32 %v1964_v29, %v296_v7  ;;  %v1978_v34 = vmul.f32 %v1966_v30, %v294_v5 }
 0x162   :  { %v1981_v35 = vmul.f32 %v1964_v29, %v266_v56  ;;  %v1999_v52 = vmul.f32 %v1966_v30, %v274_v58 }
 0x163   :  { %v443_v36 = vand.u32 2147483647, %v1969_v31  ;;  %v442_v37 = vand.u32 2147483647, %v1972_v32  ;;  %v463_v40 = vand.u32 2147483647, %v1975_v33 }
 0x164   :  { %v1985_v38 = vpop.permute.xlu1 %347  ;;  %v1987_v39 = vpop.permute.xlu0 %355  ;;  %v462_v41 = vand.u32 2147483647, %v1978_v34  ;;  %v448_v48 = vand.u32 2147483647, %v1981_v35  ;;  %v2764_v1 = vmin.f32 %v1972_v32, 0.0 }
 0x165   :  { %2750 = vst [vmem:[#allocation42_spill] sm:$0xff] %v1987_v39  ;;  %v483_v42 = vsub.f32 0.0, %v443_v36  ;;  %v482_v43 = vsub.f32 0.0, %v442_v37  ;;  %v1992_v44 = vmul.f32 %v1985_v38, %v258_v51  ;;  %v1995_v8 = vmul.f32 %v1987_v39, %v262_v55 }
 0x166   :  { %v503_v45 = vsub.f32 0.0, %v463_v40  ;;  %v502_v46 = vsub.f32 0.0, %v462_v41  ;;  %v2006_v7 = vmul.f32 %v1985_v38, %v298_v11  ;;  %v488_v37 = vsub.f32 0.0, %v448_v48 }
 0x167   :  { %v524_v49 = vmul.f32 1.442695, %v483_v42  ;;  %v522_v50 = vmul.f32 1.442695, %v482_v43  ;;  %v444_v56 = vand.u32 2147483647, %v1992_v44 }
 0x168   :  { %v2001_v54 = vpop.permute.xlu1 %351  ;;  %v446_v5 = vand.u32 2147483647, %v1995_v8  ;;  %v564_v51 = vmul.f32 1.442695, %v503_v45  ;;  %v562_v36 = vmul.f32 1.442695, %v502_v46 }
 0x169   :  { %1489 = vpow2.f32 %v524_v49  ;;  %v2010_v55 = vmul.f32 %v2001_v54, %v1904_v53  ;;  %v484_v58 = vsub.f32 0.0, %v444_v56  ;;  %v464_v45 = vand.u32 2147483647, %v2006_v7 }
 0x16a   :  { %1491 = vpow2.f32 %v522_v50  ;;  %v486_v40 = vsub.f32 0.0, %v446_v5  ;;  %v534_v11 = vmul.f32 1.442695, %v488_v37  ;;  %v452_v49 = vand.u32 2147483647, %v1999_v52 }
 0x16b   :  { %v445_v41 = vand.u32 2147483647, %v2010_v55  ;;  %1493 = vpow2.f32 %v564_v51  ;;  %v526_v42 = vmul.f32 1.442695, %v484_v58  ;;  %v504_v53 = vsub.f32 0.0, %v464_v45 }
 0x16c   :  { %v530_v43 = vmul.f32 1.442695, %v486_v40  ;;  %1495 = vpow2.f32 %v562_v36  ;;  %v2016_v46 = vmul.f32 %v2001_v54, %v300_v14  ;;  %v2020_v48 = vmul.f32 %v2001_v54, %v1912_v60 }
 0x16d   :  { %v485_v3 = vsub.f32 0.0, %v445_v41  ;;  %1497 = vpow2.f32 %v526_v42  ;;  %v492_v56 = vsub.f32 0.0, %v452_v49  ;;  %v566_v5 = vmul.f32 1.442695, %v504_v53 }
 0x16e   :  { %1499 = vpow2.f32 %v530_v43  ;;  %v465_v51 = vand.u32 2147483647, %v2016_v46  ;;  %v2025_v36 = vmul.f32 %v1966_v30, %v1906_v0  ;;  %v2029_v37 = vmul.f32 %v1966_v30, %v1932_v13 }
 0x16f   :  { %v528_v50 = vmul.f32 1.442695, %v485_v3  ;;  %v542_v58 = vmul.f32 1.442695, %v492_v56  ;;  %v450_v60 = vand.u32 2147483647, %v2020_v48  ;;  %v2041_v45 = vmul.f32 %v1987_v39, %v1940_v17 }
 0x170   :  { %v505_v56 = vsub.f32 0.0, %v465_v51 }
 0x171   :  { %1501 = vpow2.f32 %v528_v50  ;;  %v490_v0 = vsub.f32 0.0, %v450_v60 }
 0x172   :  { %1503 = vpow2.f32 %v534_v11 }
 0x173   :  { %v1490_v42 = vpop.eup %1489  ;;  %1505 = vpow2.f32 %v566_v5  ;;  %v2053_v5 = vmul.f32 %v1987_v39, %v1922_v2  ;;  %v2058_v28 = vmul.f32 1.442695, %v490_v0 }
 0x174   :  { %v1492_v49 = vpop.eup %1491  ;;  %v611_v53 = vadd.f32 1.0, %v1490_v42  ;;  %v614_v11 = vmul.f32 -0.5, %v1490_v42  ;;  %1507 = vpow2.f32 %v542_v58  ;;  %v617_v58 = vand.u32 2147483647, %v1490_v42 }
 0x175   :  { %v2044_v40 = vpop.eup %1493  ;;  %v602_v41 = vadd.f32 1.0, %v1492_v49  ;;  %v605_v43 = vmul.f32 -0.5, %v1492_v49  ;;  %v608_v60 = vand.u32 2147483647, %v1492_v49 }
 0x176   :  { %1509 = vlog2.f32 %v611_v53  ;;  %v791_v3 = vadd.f32 1.0, %v2044_v40  ;;  %v2048_v17 = vpop.eup %1495  ;;  %v2056_v53 = vmul.f32 1.442695, %v505_v56  ;;  %v615_v47 = vadd.f32 1.0, %v614_v11 }
 0x177   :  { %1511 = vlog2.f32 %v602_v41  ;;  %v1498_v50 = vpop.eup %1497  ;;  %v606_v41 = vadd.f32 1.0, %v605_v43  ;;  %v794_v62 = vmul.f32 -0.5, %v2044_v40  ;;  %v797_v2 = vand.u32 2147483647, %v2044_v40 }
 0x178   :  { %1513 = vlog2.f32 %v791_v3  ;;  %v1500_v13 = vpop.eup %1499  ;;  %v620_v27 = vadd.f32 1.0, %v1498_v50  ;;  %v623_v21 = vmul.f32 -0.5, %v1498_v50  ;;  %v626_v51 = vand.u32 2147483647, %v1498_v50 }
 0x179   :  { %v638_v14 = vadd.f32 1.0, %v1500_v13  ;;  %v641_v25 = vmul.f32 -0.5, %v1500_v13  ;;  %v782_v3 = vadd.f32 1.0, %v2048_v17  ;;  %v644_v11 = vand.u32 2147483647, %v1500_v13 }
 0x17a   :  { %1515 = vlog2.f32 %v620_v27  ;;  %v624_v22 = vadd.f32 1.0, %v623_v21  ;;  %v616_v0 = vmul.f32 %v1490_v42, %v615_v47  ;;  %vm2065_vm1 = vcmp.lt.f32.partialorder %v617_v58, 0.0004427343 }
 0x17b   :  { %v1502_v26 = vpop.eup %1501  ;;  %1517 = vlog2.f32 %v638_v14  ;;  %vm2069_vm2 = vcmp.lt.f32.partialorder %v608_v60, 0.0004427343  ;;  %v607_v10 = vmul.f32 %v1492_v49, %v606_v41  ;;  %v795_v6 = vadd.f32 1.0, %v794_v62 }
 0x17c   :  { %v2063_v56 = vpop.eup %1503  ;;  %v629_v23 = vadd.f32 1.0, %v1502_v26  ;;  %v632_v27 = vmul.f32 -0.5, %v1502_v26  ;;  %v785_v21 = vmul.f32 -0.5, %v2048_v17  ;;  %vm2078_vm3 = vcmp.lt.f32.partialorder %v626_v51, 0.0004427343 }
 0x17d   :  { %v2073_v19 = vpop.eup %1505  ;;  %v642_v42 = vadd.f32 1.0, %v641_v25  ;;  %vm2082_vm4 = vcmp.lt.f32.partialorder %v797_v2, 0.0004427343  ;;  %v656_v60 = vadd.f32 1.0, %v2063_v56  ;;  %v625_v49 = vmul.f32 %v1498_v50, %v624_v22 }
 0x17e   :  { %1519 = vlog2.f32 %v629_v23  ;;  %v2076_v14 = vpop.eup %1507  ;;  %vm2087_vm5 = vcmp.lt.f32.partialorder %v644_v11, 0.0004427343  ;;  %v635_v23 = vand.u32 2147483647, %v1502_v26  ;;  %v788_v51 = vand.u32 2147483647, %v2048_v17 }
 0x17f   :  { %1521 = vlog2.f32 %v782_v3  ;;  %v633_v30 = vadd.f32 1.0, %v632_v27  ;;  %v800_v25 = vadd.f32 1.0, %v2073_v19  ;;  %v786_v3 = vadd.f32 1.0, %v785_v21 }
 0x180   :  { %v1510_v4 = vpop.eup %1509  ;;  %1523 = vlog2.f32 %v656_v60  ;;  %v659_v9 = vmul.f32 -0.5, %v2063_v56  ;;  %v662_v22 = vand.u32 2147483647, %v2063_v56  ;;  %v796_v39 = vmul.f32 %v2044_v40, %v795_v6 }
 0x181   :  { %v1512_v41 = vpop.eup %1511  ;;  %v613_v12 = vmul.f32 0.6931472, %v1510_v4  ;;  %1525 = vlog2.f32 %v800_v25  ;;  %v2761_v4 = vmin.f32 %v1969_v31, 0.0  ;;  %v643_v24 = vmul.f32 %v1500_v13, %v642_v42 }
 0x182   :  { %v1514_v2 = vpop.eup %1513  ;;  %v604_v63 = vmul.f32 0.6931472, %v1512_v41  ;;  %vm2102_vm6 = vcmp.lt.f32.partialorder %v635_v23, 0.0004427343  ;;  %vm2108_vm7 = vcmp.lt.f32.partialorder %v788_v51, 0.0004427343 }
 0x183   :  { %v619_v50 = vsel %vm2065_vm1, %v616_v0, %v613_v12  ;;  %v793_v11 = vmul.f32 0.6931472, %v1514_v2  ;;  %v634_v12 = vmul.f32 %v1502_v26, %v633_v30  ;;  %v803_v6 = vmul.f32 -0.5, %v2073_v19 }
 0x184   :  { %v963_v27 = vsub.f32 %v2761_v4, %v619_v50  ;;  %v610_v60 = vsel %vm2069_vm2, %v607_v10, %v604_v63  ;;  %v1516_v41 = vpop.eup %1515  ;;  %v692_v31 = vadd.f32 1.0, %v2076_v14  ;;  %v787_v10 = vmul.f32 %v2048_v17, %v786_v3 }
 0x185   :  { %v962_v43 = vsub.f32 %v2764_v1, %v610_v60  ;;  %v1518_v15 = vpop.eup %1517  ;;  %v622_v63 = vmul.f32 0.6931472, %v1516_v41  ;;  %v660_v40 = vadd.f32 1.0, %v659_v9  ;;  %vm2115_vm8 = vcmp.lt.f32.partialorder %v662_v22, 0.0004427343 }
 0x186   :  { %1046 = vperm.xlu0 %1487, %v963_v27   ;;  %v640_v1 = vmul.f32 0.6931472, %v1518_v15  ;;  %v799_v26 = vsel %vm2082_vm4, %v796_v39, %v793_v11  ;;  %v806_v30 = vand.u32 2147483647, %v2073_v19  ;;  %1527 = vlog2.f32 %v692_v31 }
 0x187   :  { %1043 = vperm.xlu1 %1486, %v962_v43   ;;  %v628_v42 = vsel %vm2078_vm3, %v625_v49, %v622_v63  ;;  %v695_v23 = vmul.f32 -0.5, %v2076_v14  ;;  %1529 = vpow2.f32 %v2056_v53  ;;  %v2769_v9 = vand.u32 2147483647, %v2041_v45 }
 0x188   :  { %v1520_v32 = vpop.eup %1519  ;;  %v2770_v25 = vmin.f32 %v1992_v44, 0.0  ;;  %v646_v39 = vsel %vm2087_vm5, %v643_v24, %v640_v1  ;;  %v804_v3 = vadd.f32 1.0, %v803_v6  ;;  %v2771_v22 = vmin.f32 %v1995_v8, 0.0 }
 0x189   :  { %v506_v17 = vsub.f32 0.0, %v2769_v9  ;;  %v1522_v51 = vpop.eup %1521  ;;  %v631_v58 = vmul.f32 0.6931472, %v1520_v32  ;;  %v661_v50 = vmul.f32 %v2063_v56, %v660_v40  ;;  %1531 = vpow2.f32 %v2058_v28 }
 0x18a   :  { %v964_v2 = vsub.f32 %v2770_v25, %v628_v42  ;;  %v966_v47 = vsub.f32 %v2771_v22, %v646_v39  ;;  %v784_v49 = vmul.f32 0.6931472, %v1522_v51  ;;  %v1524_v53 = vpop.eup %1523  ;;  %v2772_v44 = vmin.f32 %v1975_v33, 0.0 }
 0x18b   :  { %v637_v11 = vsel %vm2102_vm6, %v634_v12, %v631_v58  ;;  %v570_v62 = vmul.f32 1.442695, %v506_v17  ;;  %v451_v24 = vand.u32 2147483647, %v2053_v5  ;;  %v2773_v8 = vmin.f32 %v2010_v55, 0.0  ;;  %v1526_v43 = vpop.eup %1525 }
 0x18c   :  { %1049 = vperm.xlu1 %1486, %v964_v2   ;;  %v983_v4 = vsub.f32 %v2772_v44, %v799_v26  ;;  %1055 = vperm.xlu0 %1487, %v966_v47   ;;  %v658_v60 = vmul.f32 0.6931472, %v1524_v53  ;;  %v696_v41 = vadd.f32 1.0, %v695_v23  ;;  %v2774_v56 = vand.u32 2147483647, %v2025_v36 }
 0x18d   :  { %v965_v27 = vsub.f32 %v2773_v8, %v637_v11  ;;  %v805_v6 = vmul.f32 %v2073_v19, %v804_v3  ;;  %vm2146_vm9 = vcmp.lt.f32.partialorder %v806_v30, 0.0004427343  ;;  %1533 = vpow2.f32 %v570_v62 }
 0x18e   :  { %v487_v28 = vsub.f32 0.0, %v2774_v56  ;;  %v491_v33 = vsub.f32 0.0, %v451_v24  ;;  %v790_v12 = vsel %vm2108_vm7, %v787_v10, %v784_v49  ;;  %v802_v31 = vmul.f32 0.6931472, %v1526_v43 }
 0x18f   :  { %v467_v15 = vand.u32 2147483647, %v2029_v37  ;;  %v664_v63 = vsel %vm2115_vm8, %v661_v50, %v658_v60  ;;  %v698_v40 = vand.u32 2147483647, %v2076_v14  ;;  %v2158_v1 = vmul.f32 %v1985_v38, %v1908_v57 }
 0x190   :  { %v532_v55 = vmul.f32 1.442695, %v487_v28  ;;  %1052 = vperm.xlu1 %1486, %v965_v27   ;;  %v540_v19 = vmul.f32 1.442695, %v491_v33  ;;  %1106 = vperm.xlu0 %1487, %v983_v4   ;;  %v697_v26 = vmul.f32 %v2076_v14, %v696_v41  ;;  %v2163_v10 = vmul.f32 %v1985_v38, %v1938_v16  ;;  %v1528_v30 = vpop.eup %1527 }
 0x191   :  { %v507_v0 = vsub.f32 0.0, %v467_v15  ;;  %v2777_v13 = vmin.f32 %v1978_v34, 0.0  ;;  %v449_v42 = vand.u32 2147483647, %v2158_v1  ;;  %v2170_v57 = vmul.f32 %v1964_v29, %v1910_v59  ;;  %v1530_v23 = vpop.eup %1529 }
 0x192   :  { %1535 = vpow2.f32 %v532_v55  ;;  %v2778_v14 = vmin.f32 %v1981_v35, 0.0  ;;  %v808_v17 = vsel %vm2146_vm9, %v805_v6, %v802_v31  ;;  %v694_v16 = vmul.f32 0.6931472, %v1528_v30 }
 0x193   :  { %v982_v32 = vsub.f32 %v2777_v13, %v790_v12  ;;  %1537 = vpow2.f32 %v540_v19  ;;  %v572_v51 = vmul.f32 1.442695, %v507_v0  ;;  %v412_v34 = vmin.f32 %v1999_v52, 0.0  ;;  %v1532_v39 = vpop.eup %1531 }
 0x194   :  { %v968_v9 = vsub.f32 %v2778_v14, %v664_v63  ;;  %vm699_vm10 = vcmp.lt.f32.partialorder %v698_v40, 0.0004427343  ;;  %v809_v25 = vadd.f32 1.0, %v1530_v23  ;;  %v489_v2 = vsub.f32 0.0, %v449_v42 }
 0x195   :  { %1103 = vperm.xlu1 %1486, %v982_v32   ;;  %v700_v58 = vsel %vm699_vm10, %v697_v26, %v694_v16  ;;  %v425_v59 = vmin.f32 %v2016_v46, 0.0  ;;  %1539 = vpow2.f32 %v572_v51  ;;  %v469_v35 = vand.u32 2147483647, %v2163_v10 }
 0x196   :  { %1061 = vperm.xlu0 %1487, %v968_v9   ;;  %v2779_v3 = vmin.f32 %v2006_v7, 0.0  ;;  %1541 = vlog2.f32 %v809_v25  ;;  %v812_v47 = vmul.f32 -0.5, %v1530_v23  ;;  %v453_v49 = vand.u32 2147483647, %v2170_v57 }
 0x197   :  { %v972_v50 = vsub.f32 %v412_v34, %v700_v58  ;;  %v674_v52 = vadd.f32 1.0, %v1532_v39  ;;  %v677_v53 = vmul.f32 -0.5, %v1532_v39  ;;  %v536_v11 = vmul.f32 1.442695, %v489_v2  ;;  %v1534_v44 = vpop.eup %1533 }
 0x198   :  { %v984_v22 = vsub.f32 %v2779_v3, %v808_v17  ;;  %v410_v4 = vmin.f32 %v2020_v48, 0.0  ;;  %v426_v62 = vmin.f32 %v2041_v45, 0.0  ;;  %v411_v24 = vmin.f32 %v2053_v5, 0.0 }
 0x199   :  { %v407_v8 = vmin.f32 %v2025_v36, 0.0  ;;  %1543 = vlog2.f32 %v674_v52  ;;  %v818_v7 = vadd.f32 1.0, %v1534_v44  ;;  %v427_v27 = vmin.f32 %v2029_v37, 0.0  ;;  %v2795_v37 = vld [vmem:[#allocation27_spill] sm:$0xff] }
 0x19a   :  { %1109 = vperm.xlu1 %1486, %v984_v22   ;;  %1073 = vperm.xlu0 %1487, %v972_v50   ;;  %v509_v60 = vsub.f32 0.0, %v469_v35  ;;  %v813_v41 = vadd.f32 1.0, %v812_v47  ;;  %v815_v56 = vand.u32 2147483647, %v1530_v23  ;;  %1545 = vpow2.f32 %v536_v11 }
 0x19b   :  { %v2189_v28 = vmul.f32 %v1964_v29, %v1942_v18  ;;  %v678_v6 = vadd.f32 1.0, %v677_v53  ;;  %v680_v21 = vand.u32 2147483647, %v1532_v39  ;;  %1547 = vlog2.f32 %v818_v7 }
 0x19c   :  { %v2191_v43 = vpop.eup %1535  ;;  %v493_v33 = vsub.f32 0.0, %v453_v49  ;;  %v821_v31 = vmul.f32 -0.5, %v1534_v44  ;;  %v824_v55 = vand.u32 2147483647, %v1534_v44  ;;  %v409_v63 = vmin.f32 %v2158_v1, 0.0 }
 0x19d   :  { %v2193_v12 = vpop.eup %1537  ;;  %v647_v15 = vadd.f32 1.0, %v2191_v43  ;;  %v429_v19 = vmin.f32 %v2163_v10, 0.0  ;;  %v576_v18 = vmul.f32 1.442695, %v509_v60  ;;  %v413_v26 = vmin.f32 %v2170_v57, 0.0 }
 0x19e   :  { %v683_v40 = vadd.f32 1.0, %v2193_v12  ;;  %v814_v0 = vmul.f32 %v1530_v23, %v813_v41  ;;  %vm2200_vm11 = vcmp.lt.f32.partialorder %v815_v56, 0.0004427343  ;;  %v473_v13 = vand.u32 2147483647, %v2189_v28 }
 0x19f   :  { %1549 = vlog2.f32 %v647_v15  ;;  %v2205_v32 = vpop.eup %1539  ;;  %v679_v42 = vmul.f32 %v1532_v39, %v678_v6  ;;  %vm2207_vm12 = vcmp.lt.f32.partialorder %v680_v21, 0.0004427343  ;;  %v544_v9 = vmul.f32 1.442695, %v493_v33 }
 0x1a0   :  { %1551 = vlog2.f32 %v683_v40  ;;  %v1542_v17 = vpop.eup %1541  ;;  %v822_v16 = vadd.f32 1.0, %v821_v31  ;;  %vm2211_vm13 = vcmp.lt.f32.partialorder %v824_v55, 0.0004427343  ;;  %v650_v51 = vmul.f32 -0.5, %v2191_v43 }
 0x1a1   :  { %v827_v34 = vadd.f32 1.0, %v2205_v32  ;;  %v811_v25 = vmul.f32 0.6931472, %v1542_v17  ;;  %v686_v2 = vmul.f32 -0.5, %v2193_v12  ;;  %1553 = vpow2.f32 %v576_v18 }
 0x1a2   :  { %v513_v39 = vsub.f32 0.0, %v473_v13  ;;  %v689_v58 = vand.u32 2147483647, %v2193_v12  ;;  %v653_v35 = vand.u32 2147483647, %v2191_v43  ;;  %v2222_v3 = vmul.f32 %v1985_v38, %v1914_v61 }
 0x1a3   :  { %1555 = vlog2.f32 %v827_v34  ;;  %v1544_v22 = vpop.eup %1543  ;;  %v817_v47 = vsel %vm2200_vm11, %v814_v0, %v811_v25  ;;  %v830_v49 = vmul.f32 -0.5, %v2205_v32  ;;  %v823_v7 = vmul.f32 %v1534_v44, %v822_v16  ;;  %v2790_v16 = vld [vmem:[#allocation25_spill] sm:$0xff]  ;;  %v2792_v25 = vld [vmem:[#allocation42_spill] sm:$0xff] }
 0x1a4   :  { %1557 = vpow2.f32 %v544_v9  ;;  %v584_v50 = vmul.f32 1.442695, %v513_v39  ;;  %v2227_v52 = vpop.eup %1545  ;;  %v985_v53 = vsub.f32 %v425_v59, %v817_v47  ;;  %v676_v11 = vmul.f32 0.6931472, %v1544_v22 }
 0x1a5   :  { %v2233_v60 = vmul.f32 %v2001_v54, %v1946_v20  ;;  %v1548_v61 = vpop.eup %1547  ;;  %v687_v41 = vadd.f32 1.0, %v686_v2  ;;  %v651_v56 = vadd.f32 1.0, %v650_v51  ;;  %v665_v6 = vadd.f32 1.0, %v2227_v52 }
 0x1a6   :  { %1559 = vpow2.f32 %v584_v50  ;;  %1112 = vperm.xlu1 %1486, %v985_v53   ;;  %v682_v21 = vsel %vm2207_vm12, %v679_v42, %v676_v11  ;;  %v820_v33 = vmul.f32 0.6931472, %v1548_v61  ;;  %vm2238_vm14 = vcmp.lt.f32.partialorder %v689_v58, 0.0004427343 }
 0x1a7   :  { %v454_v59 = vand.u32 2147483647, %v2222_v3  ;;  %v970_v20 = vsub.f32 %v410_v4, %v682_v21  ;;  %vm2245_vm15 = vcmp.lt.f32.partialorder %v653_v35, 0.0004427343  ;;  %v831_v31 = vadd.f32 1.0, %v830_v49 }
 0x1a8   :  { %1561 = vlog2.f32 %v665_v6  ;;  %v826_v15 = vsel %vm2211_vm13, %v823_v7, %v820_v33  ;;  %v668_v40 = vmul.f32 -0.5, %v2227_v52  ;;  %v470_v0 = vand.u32 2147483647, %v2233_v60 }
 0x1a9   :  { %v1550_v55 = vpop.eup %1549  ;;  %v494_v18 = vsub.f32 0.0, %v454_v59  ;;  %1067 = vperm.xlu0 %1487, %v970_v20   ;;  %v986_v48 = vsub.f32 %v426_v62, %v826_v15  ;;  %v652_v13 = vmul.f32 %v2191_v43, %v651_v56  ;;  %v833_v42 = vand.u32 2147483647, %v2205_v32  ;;  %v2791_v43 = vld [vmem:[#allocation36_spill] sm:$0xff] }
 0x1aa   :  { %v1552_v30 = vpop.eup %1551  ;;  %v649_v4 = vmul.f32 0.6931472, %v1550_v55  ;;  %v688_v9 = vmul.f32 %v2193_v12, %v687_v41  ;;  %v2260_v23 = vmul.f32 %v2001_v54, %v2790_v16  ;;  %v832_v62 = vmul.f32 %v2205_v32, %v831_v31 }
 0x1ab   :  { %v685_v14 = vmul.f32 0.6931472, %v1552_v30  ;;  %v546_v17 = vmul.f32 1.442695, %v494_v18  ;;  %v2262_v51 = vpop.eup %1553  ;;  %1115 = vperm.xlu1 %1486, %v986_v48   ;;  %v510_v34 = vsub.f32 0.0, %v470_v0  ;;  %v2269_v2 = vmul.f32 %v2792_v25, %v2791_v43  ;;  %v2797_v30 = vld [vmem:[#allocation41_spill] sm:$0xff] }
 0x1ac   :  { %v655_v45 = vsel %vm2245_vm15, %v652_v13, %v649_v4  ;;  %v669_v58 = vadd.f32 1.0, %v668_v40  ;;  %v671_v35 = vand.u32 2147483647, %v2227_v52  ;;  %v845_v22 = vadd.f32 1.0, %v2262_v51 }
 0x1ad   :  { %v1556_v39 = vpop.eup %1555  ;;  %v691_v12 = vsel %vm2238_vm14, %v688_v9, %v685_v14  ;;  %v967_v32 = vsub.f32 %v407_v8, %v655_v45  ;;  %1563 = vpow2.f32 %v546_v17  ;;  %vm2281_vm0 = vcmp.lt.f32.partialorder %v833_v42, 0.0004427343  ;;  %v2798_v14 = vld [vmem:[#allocation29_spill] sm:$0xff] }
 0x1ae   :  { %v2275_v47 = vpop.eup %1557  ;;  %v971_v49 = vsub.f32 %v411_v24, %v691_v12  ;;  %v829_v50 = vmul.f32 0.6931472, %v1556_v39  ;;  %1565 = vlog2.f32 %v845_v22  ;;  %v455_v7 = vand.u32 2147483647, %v2260_v23 }
 0x1af   :  { %v701_v11 = vadd.f32 1.0, %v2275_v47  ;;  %1058 = vperm.xlu1 %1486, %v967_v32   ;;  %v848_v36 = vmul.f32 -0.5, %v2262_v51  ;;  %v578_v24 = vmul.f32 1.442695, %v510_v34  ;;  %v471_v8 = vand.u32 2147483647, %v2269_v2 }
 0x1b0   :  { %v2287_v61 = vpop.eup %1559  ;;  %1070 = vperm.xlu0 %1487, %v971_v49   ;;  %v835_v5 = vsel %vm2281_vm0, %v832_v62, %v829_v50  ;;  %v433_v41 = vmin.f32 %v2189_v28, 0.0  ;;  %v414_v56 = vmin.f32 %v2222_v3, 0.0  ;;  %v430_v6 = vmin.f32 %v2233_v60, 0.0 }
 0x1b1   :  { %1567 = vlog2.f32 %v701_v11  ;;  %v987_v33 = vsub.f32 %v427_v27, %v835_v5  ;;  %v670_v46 = vmul.f32 %v2227_v52, %v669_v58  ;;  %vm672_vm1 = vcmp.lt.f32.partialorder %v671_v35, 0.0004427343  ;;  %v2796_v52 = vld [vmem:[#allocation24_spill] sm:$0xff]  ;;  %v2801_v5 = vld [vmem:[#allocation26_spill] sm:$0xff] }
 0x1b2   :  { %v1562_v21 = vpop.eup %1561  ;;  %v881_v59 = vadd.f32 1.0, %v2287_v61  ;;  %v851_v44 = vand.u32 2147483647, %v2262_v51  ;;  %1569 = vpow2.f32 %v578_v24  ;;  %v495_v31 = vsub.f32 0.0, %v455_v7 }
 0x1b3   :  { %v667_v20 = vmul.f32 0.6931472, %v1562_v21  ;;  %v849_v55 = vadd.f32 1.0, %v848_v36  ;;  %v704_v15 = vmul.f32 -0.5, %v2275_v47  ;;  %v511_v40 = vsub.f32 0.0, %v471_v8 }
 0x1b4   :  { %1118 = vperm.xlu0 %1487, %v987_v33   ;;  %1571 = vlog2.f32 %v881_v59  ;;  %v548_v0 = vmul.f32 1.442695, %v495_v31  ;;  %v2304_v27 = vmul.f32 %v2792_v25, %v2795_v37  ;;  %v2308_v48 = vmul.f32 %v2797_v30, %v2796_v52 }
 0x1b5   :  { %v673_v18 = vsel %vm672_vm1, %v670_v46, %v667_v20  ;;  %v884_v13 = vmul.f32 -0.5, %v2287_v61  ;;  %v580_v42 = vmul.f32 1.442695, %v511_v40  ;;  %v2315_v9 = vmul.f32 %v1964_v29, %v2798_v14 }
 0x1b6   :  { %v969_v4 = vsub.f32 %v409_v63, %v673_v18  ;;  %vm2317_vm2 = vcmp.lt.f32.partialorder %v851_v44, 0.0004427343  ;;  %v415_v16 = vmin.f32 %v2260_v23, 0.0  ;;  %1573 = vpow2.f32 %v548_v0 }
 0x1b7   :  { %v456_v45 = vand.u32 2147483647, %v2304_v27  ;;  %v2323_v62 = vpop.eup %1563  ;;  %v705_v1 = vadd.f32 1.0, %v704_v15  ;;  %1575 = vpow2.f32 %v580_v42  ;;  %v457_v63 = vand.u32 2147483647, %v2308_v48  ;;  %v2802_v42 = vld [vmem:[#allocation31_spill] sm:$0xff] }
 0x1b8   :  { %1064 = vperm.xlu1 %1486, %v969_v4   ;;  %v468_v34 = vand.u32 2147483647, %v2315_v9  ;;  %v1566_v43 = vpop.eup %1565  ;;  %v850_v39 = vmul.f32 %v2262_v51, %v849_v55  ;;  %v707_v12 = vand.u32 2147483647, %v2275_v47  ;;  %v710_v58 = vadd.f32 1.0, %v2323_v62 }
 0x1b9   :  { %v496_v35 = vsub.f32 0.0, %v456_v45  ;;  %v847_v22 = vmul.f32 0.6931472, %v1566_v43  ;;  %v885_v49 = vadd.f32 1.0, %v884_v13  ;;  %v497_v32 = vsub.f32 0.0, %v457_v63  ;;  %v2803_v63 = vld [vmem:[#allocation28_spill] sm:$0xff] }
 0x1ba   :  { %v508_v50 = vsub.f32 0.0, %v468_v34  ;;  %v887_v11 = vand.u32 2147483647, %v2287_v61  ;;  %1577 = vlog2.f32 %v710_v58  ;;  %v2333_v36 = vmul.f32 %v1985_v38, %v2801_v5 }
 0x1bb   :  { %v1568_v53 = vpop.eup %1567  ;;  %v550_v7 = vmul.f32 1.442695, %v496_v35  ;;  %v853_v51 = vsel %vm2317_vm2, %v850_v39, %v847_v22  ;;  %v706_v8 = vmul.f32 %v2275_v47, %v705_v1  ;;  %v552_v21 = vmul.f32 1.442695, %v497_v32 }
 0x1bc   :  { %v703_v24 = vmul.f32 0.6931472, %v1568_v53  ;;  %v2338_v33 = vpop.eup %1569  ;;  %v989_v46 = vsub.f32 %v429_v19, %v853_v51  ;;  %vm708_vm3 = vcmp.lt.f32.partialorder %v707_v12, 0.0004427343  ;;  %v574_v59 = vmul.f32 1.442695, %v508_v50 }
 0x1bd   :  { %1579 = vpow2.f32 %v550_v7  ;;  %v886_v31 = vmul.f32 %v2287_v61, %v885_v49  ;;  %v713_v55 = vmul.f32 -0.5, %v2323_v62  ;;  %v854_v15 = vadd.f32 1.0, %v2338_v33 }
 0x1be   :  { %v1572_v20 = vpop.eup %1571  ;;  %v709_v44 = vsel %vm708_vm3, %v706_v8, %v703_v24  ;;  %1124 = vperm.xlu0 %1487, %v989_v46   ;;  %1581 = vpow2.f32 %v552_v21  ;;  %v459_v10 = vand.u32 2147483647, %v2333_v36  ;;  %vm888_vm4 = vcmp.lt.f32.partialorder %v887_v11, 0.0004427343 }
 0x1bf   :  { %v973_v47 = vsub.f32 %v413_v26, %v709_v44  ;;  %v883_v40 = vmul.f32 0.6931472, %v1572_v20  ;;  %1583 = vlog2.f32 %v854_v15  ;;  %v431_v19 = vmin.f32 %v2269_v2, 0.0 }
 0x1c0   :  { %v416_v18 = vmin.f32 %v2304_v27, 0.0  ;;  %v1574_v0 = vpop.eup %1573  ;;  %v716_v37 = vand.u32 2147483647, %v2323_v62  ;;  %1585 = vpow2.f32 %v574_v59  ;;  %v499_v52 = vsub.f32 0.0, %v459_v10 }
 0x1c1   :  { %1076 = vperm.xlu1 %1486, %v973_v47   ;;  %v889_v61 = vsel %vm888_vm4, %v886_v31, %v883_v40  ;;  %v1576_v4 = vpop.eup %1575  ;;  %v714_v26 = vadd.f32 1.0, %v713_v55  ;;  %v719_v13 = vadd.f32 1.0, %v1574_v0  ;;  %v2355_v14 = vmul.f32 %v2797_v30, %v2802_v42 }
 0x1c2   :  { %v993_v57 = vsub.f32 %v433_v41, %v889_v61  ;;  %v857_v17 = vmul.f32 -0.5, %v2338_v33  ;;  %v863_v45 = vadd.f32 1.0, %v1576_v4  ;;  %v417_v1 = vmin.f32 %v2308_v48, 0.0 }
 0x1c3   :  { %v2361_v34 = vmul.f32 %v2001_v54, %v2803_v63  ;;  %v860_v43 = vand.u32 2147483647, %v2338_v33  ;;  %1587 = vlog2.f32 %v719_v13  ;;  %v722_v28 = vmul.f32 -0.5, %v1574_v0 }
 0x1c4   :  { %1136 = vperm.xlu0 %1487, %v993_v57   ;;  %v556_v41 = vmul.f32 1.442695, %v499_v52  ;;  %v1578_v39 = vpop.eup %1577  ;;  %vm2364_vm5 = vcmp.lt.f32.partialorder %v716_v37, 0.0004427343  ;;  %v725_v58 = vand.u32 2147483647, %v1574_v0  ;;  %1589 = vlog2.f32 %v863_v45 }
 0x1c5   :  { %v866_v35 = vmul.f32 -0.5, %v1576_v4  ;;  %v712_v22 = vmul.f32 0.6931472, %v1578_v39  ;;  %v715_v49 = vmul.f32 %v2323_v62, %v714_v26  ;;  %v472_v32 = vand.u32 2147483647, %v2355_v14  ;;  %v2812_v57 = vld [vmem:[#allocation32_spill] sm:$0xff] }
 0x1c6   :  { %1591 = vpow2.f32 %v556_v41  ;;  %v858_v53 = vadd.f32 1.0, %v857_v17  ;;  %v869_v11 = vand.u32 2147483647, %v1576_v4  ;;  %v428_v7 = vmin.f32 %v2315_v9, 0.0 }
 0x1c7   :  { %v1580_v50 = vpop.eup %1579  ;;  %v460_v5 = vand.u32 2147483647, %v2361_v34  ;;  %v718_v51 = vsel %vm2364_vm5, %v715_v49, %v712_v22  ;;  %vm2374_vm6 = vcmp.lt.f32.partialorder %v860_v43, 0.0004427343  ;;  %v723_v8 = vadd.f32 1.0, %v722_v28 }
 0x1c8   :  { %v728_v21 = vadd.f32 1.0, %v1580_v50  ;;  %v1582_v62 = vpop.eup %1581  ;;  %v974_v46 = vsub.f32 %v414_v56, %v718_v51  ;;  %vm2380_vm7 = vcmp.lt.f32.partialorder %v725_v58, 0.0004427343  ;;  %v867_v20 = vadd.f32 1.0, %v866_v35  ;;  %v2815_v58 = vld [vmem:[#allocation30_spill] sm:$0xff] }
 0x1c9   :  { %v731_v44 = vmul.f32 -0.5, %v1580_v50  ;;  %v1584_v31 = vpop.eup %1583  ;;  %v734_v55 = vand.u32 2147483647, %v1580_v50  ;;  %v737_v15 = vadd.f32 1.0, %v1582_v62  ;;  %v512_v47 = vsub.f32 0.0, %v472_v32 }
 0x1ca   :  { %1593 = vlog2.f32 %v728_v21  ;;  %v2384_v40 = vpop.eup %1585  ;;  %1079 = vperm.xlu1 %1486, %v974_v46   ;;  %v856_v10 = vmul.f32 0.6931472, %v1584_v31  ;;  %v859_v61 = vmul.f32 %v2338_v33, %v858_v53  ;;  %vm2387_vm8 = vcmp.lt.f32.partialorder %v869_v11, 0.0004427343  ;;  %v2819_v31 = vld [vmem:[#allocation34_spill] sm:$0xff] }
 0x1cb   :  { %v500_v56 = vsub.f32 0.0, %v460_v5  ;;  %v724_v37 = vmul.f32 %v1574_v0, %v723_v8  ;;  %1595 = vlog2.f32 %v737_v15  ;;  %v836_v52 = vadd.f32 1.0, %v2384_v40  ;;  %v2820_v15 = vld [vmem:[#allocation37_spill] sm:$0xff] }
 0x1cc   :  { %v2394_v26 = vmul.f32 %v1985_v38, %v2812_v57  ;;  %v862_v13 = vsel %vm2374_vm6, %v859_v61, %v856_v10  ;;  %v868_v42 = vmul.f32 %v1576_v4, %v867_v20  ;;  %v732_v17 = vadd.f32 1.0, %v731_v44  ;;  %v2818_v20 = vld [vmem:[#allocation35_spill] sm:$0xff] }
 0x1cd   :  { %v740_v45 = vmul.f32 -0.5, %v1582_v62  ;;  %v1588_v33 = vpop.eup %1587  ;;  %v990_v63 = vsub.f32 %v430_v6, %v862_v13  ;;  %vm2400_vm9 = vcmp.lt.f32.partialorder %v734_v55, 0.0004427343  ;;  %1597 = vlog2.f32 %v836_v52 }
 0x1ce   :  { %v582_v0 = vmul.f32 1.442695, %v512_v47  ;;  %v1590_v28 = vpop.eup %1589  ;;  %v721_v41 = vmul.f32 0.6931472, %v1588_v33  ;;  %v743_v39 = vand.u32 2147483647, %v1582_v62  ;;  %v2406_v35 = vmul.f32 %v2792_v25, %v2815_v58 }
 0x1cf   :  { %v558_v12 = vmul.f32 1.442695, %v500_v56  ;;  %1127 = vperm.xlu0 %1487, %v990_v63   ;;  %v865_v22 = vmul.f32 0.6931472, %v1590_v28  ;;  %v839_v60 = vmul.f32 -0.5, %v2384_v40  ;;  %v733_v32 = vmul.f32 %v1580_v50, %v732_v17  ;;  %v2823_v58 = vld [vmem:[#allocation38_spill] sm:$0xff] }
 0x1d0   :  { %v2408_v4 = vpop.eup %1591  ;;  %1599 = vpow2.f32 %v582_v0  ;;  %v474_v6 = vand.u32 2147483647, %v2394_v26  ;;  %v727_v49 = vsel %vm2380_vm7, %v724_v37, %v721_v41  ;;  %v741_v53 = vadd.f32 1.0, %v740_v45 }
 0x1d1   :  { %v755_v11 = vadd.f32 1.0, %v2408_v4  ;;  %v975_v5 = vsub.f32 %v415_v16, %v727_v49  ;;  %v871_v51 = vsel %vm2387_vm8, %v868_v42, %v865_v22  ;;  %1601 = vpow2.f32 %v558_v12 }
 0x1d2   :  { %v514_v24 = vsub.f32 0.0, %v474_v6  ;;  %v991_v8 = vsub.f32 %v431_v19, %v871_v51  ;;  %vm2421_vm10 = vcmp.lt.f32.partialorder %v743_v39, 0.0004427343  ;;  %v842_v50 = vand.u32 2147483647, %v2384_v40 }
 0x1d3   :  { %1603 = vlog2.f32 %v755_v11  ;;  %1082 = vperm.xlu1 %1486, %v975_v5   ;;  %v840_v59 = vadd.f32 1.0, %v839_v60  ;;  %v461_v16 = vand.u32 2147483647, %v2406_v35  ;;  %v2429_v44 = vmul.f32 %v2001_v54, %v2818_v20  ;;  %v2825_v20 = vld [vmem:[#allocation40_spill] sm:$0xff] }
 0x1d4   :  { %v1594_v46 = vpop.eup %1593  ;;  %v586_v23 = vmul.f32 1.442695, %v514_v24  ;;  %1130 = vperm.xlu0 %1487, %v991_v8   ;;  %v742_v19 = vmul.f32 %v1582_v62, %v741_v53  ;;  %v2433_v55 = vmul.f32 %v2797_v30, %v2819_v31  ;;  %v2437_v47 = vmul.f32 %v2792_v25, %v2820_v15 }
 0x1d5   :  { %v730_v2 = vmul.f32 0.6931472, %v1594_v46  ;;  %v1596_v10 = vpop.eup %1595  ;;  %v758_v61 = vmul.f32 -0.5, %v2408_v4  ;;  %v501_v3 = vsub.f32 0.0, %v461_v16  ;;  %v475_v56 = vand.u32 2147483647, %v2429_v44 }
 0x1d6   :  { %1605 = vpow2.f32 %v586_v23  ;;  %v739_v52 = vmul.f32 0.6931472, %v1596_v10  ;;  %vm2443_vm11 = vcmp.lt.f32.partialorder %v842_v50, 0.0004427343  ;;  %v477_v30 = vand.u32 2147483647, %v2433_v55 }
 0x1d7   :  { %v736_v37 = vsel %vm2400_vm9, %v733_v32, %v730_v2  ;;  %v1598_v57 = vpop.eup %1597  ;;  %v841_v42 = vmul.f32 %v2384_v40, %v840_v59  ;;  %v560_v17 = vmul.f32 1.442695, %v501_v3  ;;  %v515_v45 = vsub.f32 0.0, %v475_v56  ;;  %v2824_v59 = vld [vmem:[#allocation23_spill] sm:$0xff] }
 0x1d8   :  { %v976_v13 = vsub.f32 %v416_v18, %v736_v37  ;;  %v745_v33 = vsel %vm2421_vm10, %v742_v19, %v739_v52  ;;  %v838_v63 = vmul.f32 0.6931472, %v1598_v57  ;;  %v517_v43 = vsub.f32 0.0, %v477_v30 }
 0x1d9   :  { %v476_v0 = vand.u32 2147483647, %v2437_v47  ;;  %v977_v41 = vsub.f32 %v417_v1, %v745_v33  ;;  %v759_v39 = vadd.f32 1.0, %v758_v61  ;;  %1607 = vpow2.f32 %v560_v17 }
 0x1da   :  { %v2454_v28 = vpop.eup %1599  ;;  %1085 = vperm.xlu1 %1486, %v976_v13   ;;  %v588_v27 = vmul.f32 1.442695, %v515_v45  ;;  %v844_v18 = vsel %vm2443_vm11, %v841_v42, %v838_v63  ;;  %v761_v40 = vand.u32 2147483647, %v2408_v4  ;;  %v2464_v22 = vmul.f32 %v1985_v38, %v2823_v58 }
 0x1db   :  { %v872_v12 = vadd.f32 1.0, %v2454_v28  ;;  %v2466_v60 = vpop.eup %1601  ;;  %1088 = vperm.xlu0 %1487, %v977_v41   ;;  %v988_v48 = vsub.f32 %v428_v7, %v844_v18  ;;  %v592_v1 = vmul.f32 1.442695, %v517_v43  ;;  %v516_v6 = vsub.f32 0.0, %v476_v0 }
 0x1dc   :  { %1609 = vpow2.f32 %v588_v27  ;;  %v764_v32 = vadd.f32 1.0, %v2466_v60  ;;  %v760_v11 = vmul.f32 %v2408_v4, %v759_v39  ;;  %v419_v38 = vmin.f32 %v2333_v36, 0.0 }
 0x1dd   :  { %v1604_v49 = vpop.eup %1603  ;;  %1611 = vlog2.f32 %v872_v12  ;;  %vm762_vm12 = vcmp.lt.f32.partialorder %v761_v40, 0.0004427343  ;;  %v590_v5 = vmul.f32 1.442695, %v516_v6  ;;  %v875_v7 = vmul.f32 -0.5, %v2454_v28 }
 0x1de   :  { %1121 = vperm.xlu1 %1486, %v988_v48   ;;  %v757_v53 = vmul.f32 0.6931472, %v1604_v49  ;;  %1613 = vpow2.f32 %v592_v1  ;;  %v479_v24 = vand.u32 2147483647, %v2464_v22  ;;  %v432_v21 = vmin.f32 %v2355_v14, 0.0  ;;  %v2832_v48 = vld [vmem:[#allocation33_spill] sm:$0xff] }
 0x1df   :  { %1615 = vlog2.f32 %v764_v32  ;;  %v767_v46 = vmul.f32 -0.5, %v2466_v60  ;;  %v2479_v36 = vmul.f32 %v1964_v29, %v2824_v59  ;;  %v878_v23 = vand.u32 2147483647, %v2454_v28 }
 0x1e0   :  { %v1606_v51 = vpop.eup %1605  ;;  %v763_v9 = vsel %vm762_vm12, %v760_v11, %v757_v53  ;;  %1617 = vpow2.f32 %v590_v5  ;;  %v519_v4 = vsub.f32 0.0, %v479_v24  ;;  %v420_v16 = vmin.f32 %v2361_v34, 0.0 }
 0x1e1   :  { %v979_v8 = vsub.f32 %v419_v38, %v763_v9  ;;  %v890_v50 = vadd.f32 1.0, %v1606_v51  ;;  %v2485_v2 = vmul.f32 %v2001_v54, %v2825_v20  ;;  %v876_v19 = vadd.f32 1.0, %v875_v7 }
 0x1e2   :  { %v434_v31 = vmin.f32 %v2394_v26, 0.0  ;;  %v596_v15 = vmul.f32 1.442695, %v519_v4  ;;  %v458_v10 = vand.u32 2147483647, %v2479_v36  ;;  %v893_v3 = vmul.f32 -0.5, %v1606_v51 }
 0x1e3   :  { %1094 = vperm.xlu0 %1487, %v979_v8   ;;  %1619 = vlog2.f32 %v890_v50  ;;  %v2487_v14 = vpop.eup %1607  ;;  %v770_v61 = vand.u32 2147483647, %v2466_v60  ;;  %v421_v56 = vmin.f32 %v2406_v35, 0.0  ;;  %v768_v52 = vadd.f32 1.0, %v767_v46  ;;  %v2833_v46 = vld [vmem:[#allocation39_spill] sm:$0xff] }
 0x1e4   :  { %v773_v34 = vadd.f32 1.0, %v2487_v14  ;;  %v435_v54 = vmin.f32 %v2429_v44, 0.0  ;;  %1621 = vpow2.f32 %v596_v15  ;;  %v480_v62 = vand.u32 2147483647, %v2485_v2 }
 0x1e5   :  { %vm2498_vm13 = vcmp.lt.f32.partialorder %v878_v23, 0.0004427343  ;;  %v896_v57 = vand.u32 2147483647, %v1606_v51  ;;  %v877_v45 = vmul.f32 %v2454_v28, %v876_v19  ;;  %v498_v33 = vsub.f32 0.0, %v458_v10 }
 0x1e6   :  { %v2494_v37 = vpop.eup %1609  ;;  %1623 = vlog2.f32 %v773_v34  ;;  %v520_v63 = vsub.f32 0.0, %v480_v62  ;;  %vm2506_vm14 = vcmp.lt.f32.partialorder %v770_v61, 0.0004427343  ;;  %v894_v41 = vadd.f32 1.0, %v893_v3 }
 0x1e7   :  { %v1612_v30 = vpop.eup %1611  ;;  %v899_v13 = vadd.f32 1.0, %v2494_v37  ;;  %v769_v40 = vmul.f32 %v2466_v60, %v768_v52  ;;  %v776_v12 = vmul.f32 -0.5, %v2487_v14  ;;  %vm2515_vm15 = vcmp.lt.f32.partialorder %v896_v57, 0.0004427343 }
 0x1e8   :  { %v2503_v42 = vpop.eup %1613  ;;  %v874_v17 = vmul.f32 0.6931472, %v1612_v30  ;;  %v2521_v1 = vmul.f32 %v1964_v29, %v2832_v48  ;;  %v902_v32 = vmul.f32 -0.5, %v2494_v37  ;;  %v554_v60 = vmul.f32 1.442695, %v498_v33 }
 0x1e9   :  { %v1616_v43 = vpop.eup %1615  ;;  %1625 = vlog2.f32 %v899_v13  ;;  %v917_v39 = vadd.f32 1.0, %v2503_v42  ;;  %v598_v53 = vmul.f32 1.442695, %v520_v63  ;;  %v895_v5 = vmul.f32 %v1606_v51, %v894_v41 }
 0x1ea   :  { %v880_v27 = vsel %vm2498_vm13, %v877_v45, %v874_v17  ;;  %v766_v18 = vmul.f32 0.6931472, %v1616_v43  ;;  %v2523_v6 = vpop.eup %1617  ;;  %v920_v9 = vmul.f32 -0.5, %v2503_v42  ;;  %v777_v29 = vadd.f32 1.0, %v776_v12 }
 0x1eb   :  { %v992_v28 = vsub.f32 %v432_v21, %v880_v27  ;;  %1627 = vlog2.f32 %v917_v39  ;;  %v908_v7 = vadd.f32 1.0, %v2523_v6  ;;  %v779_v8 = vand.u32 2147483647, %v2487_v14 }
 0x1ec   :  { %v772_v49 = vsel %vm2506_vm14, %v769_v40, %v766_v18  ;;  %1629 = vpow2.f32 %v554_v60  ;;  %v905_v21 = vand.u32 2147483647, %v2494_v37  ;;  %v478_v50 = vand.u32 2147483647, %v2521_v1 }
 0x1ed   :  { %v1620_v11 = vpop.eup %1619  ;;  %1133 = vperm.xlu1 %1486, %v992_v28   ;;  %v980_v38 = vsub.f32 %v420_v16, %v772_v49  ;;  %1631 = vlog2.f32 %v908_v7  ;;  %v2535_v4 = vmul.f32 %v2792_v25, %v2833_v46  ;;  %v903_v23 = vadd.f32 1.0, %v902_v32 }
 0x1ee   :  { %v892_v24 = vmul.f32 0.6931472, %v1620_v11  ;;  %v2537_v51 = vpop.eup %1621  ;;  %v437_v16 = vmin.f32 %v2433_v55, 0.0  ;;  %1633 = vpow2.f32 %v598_v53  ;;  %v921_v15 = vadd.f32 1.0, %v920_v9 }
 0x1ef   :  { %1097 = vperm.xlu0 %1487, %v980_v38   ;;  %v911_v10 = vmul.f32 -0.5, %v2523_v6  ;;  %v935_v61 = vadd.f32 1.0, %v2537_v51  ;;  %v778_v25 = vmul.f32 %v2487_v14, %v777_v29  ;;  %vm780_vm0 = vcmp.lt.f32.partialorder %v779_v8, 0.0004427343 }
 0x1f0   :  { %v898_v59 = vsel %vm2515_vm15, %v895_v5, %v892_v24  ;;  %v1624_v20 = vpop.eup %1623  ;;  %v518_v34 = vsub.f32 0.0, %v478_v50  ;;  %vm2545_vm1 = vcmp.lt.f32.partialorder %v905_v21, 0.0004427343  ;;  %v923_v55 = vand.u32 2147483647, %v2503_v42  ;;  %v2836_v24 = vld [vmem:[#allocation22_spill] sm:$0xff] }
 0x1f1   :  { %v994_v19 = vsub.f32 %v434_v31, %v898_v59  ;;  %v775_v3 = vmul.f32 0.6931472, %v1624_v20  ;;  %1635 = vlog2.f32 %v935_v61  ;;  %v481_v31 = vand.u32 2147483647, %v2535_v4 }
 0x1f2   :  { %v904_v57 = vmul.f32 %v2494_v37, %v903_v23  ;;  %v594_v13 = vmul.f32 1.442695, %v518_v34  ;;  %v922_v45 = vmul.f32 %v2503_v42, %v921_v15  ;;  %v912_v33 = vadd.f32 1.0, %v911_v10 }
 0x1f3   :  { %v1626_v52 = vpop.eup %1625  ;;  %1139 = vperm.xlu1 %1486, %v994_v19   ;;  %v781_v30 = vsel %vm780_vm0, %v778_v25, %v775_v3  ;;  %v521_v63 = vsub.f32 0.0, %v481_v31  ;;  %v938_v41 = vmul.f32 -0.5, %v2537_v51  ;;  %vm924_vm2 = vcmp.lt.f32.partialorder %v923_v55, 0.0004427343 }
 0x1f4   :  { %v901_v26 = vmul.f32 0.6931472, %v1626_v52  ;;  %v981_v14 = vsub.f32 %v421_v56, %v781_v30  ;;  %1637 = vpow2.f32 %v594_v13  ;;  %v914_v39 = vand.u32 2147483647, %v2523_v6 }
 0x1f5   :  { %v1628_v17 = vpop.eup %1627  ;;  %v600_v35 = vmul.f32 1.442695, %v521_v63  ;;  %v436_v40 = vmin.f32 %v2437_v47, 0.0  ;;  %v913_v48 = vmul.f32 %v2523_v6, %v912_v33  ;;  %v939_v49 = vadd.f32 1.0, %v938_v41 }
 0x1f6   :  { %v907_v43 = vsel %vm2545_vm1, %v904_v57, %v901_v26  ;;  %v919_v0 = vmul.f32 0.6931472, %v1628_v17  ;;  %1100 = vperm.xlu0 %1487, %v981_v14   ;;  %v1630_v56 = vpop.eup %1629  ;;  %vm915_vm3 = vcmp.lt.f32.partialorder %v914_v39, 0.0004427343  ;;  %v941_v44 = vand.u32 2147483647, %v2537_v51 }
 0x1f7   :  { %v995_v37 = vsub.f32 %v435_v54, %v907_v43  ;;  %v1632_v42 = vpop.eup %1631  ;;  %v746_v12 = vadd.f32 1.0, %v1630_v56  ;;  %1639 = vpow2.f32 %v600_v35  ;;  %v940_v47 = vmul.f32 %v2537_v51, %v939_v49 }
 0x1f8   :  { %v925_v27 = vsel %vm924_vm2, %v922_v45, %v919_v0  ;;  %v1634_v28 = vpop.eup %1633  ;;  %v910_v58 = vmul.f32 0.6931472, %v1632_v42  ;;  %v749_v38 = vmul.f32 -0.5, %v1630_v56  ;;  %v439_v5 = vmin.f32 %v2464_v22, 0.0 }
 0x1f9   :  { %1142 = vperm.xlu1 %1486, %v995_v37   ;;  %v997_v18 = vsub.f32 %v437_v16, %v925_v27  ;;  %1641 = vlog2.f32 %v746_v12  ;;  %v944_v54 = vadd.f32 1.0, %v1634_v28  ;;  %vm942_vm4 = vcmp.lt.f32.partialorder %v941_v44, 0.0004427343  ;;  %v2837_v16 = vld [vmem:[#allocation21_spill] sm:$0xff] }
 0x1fa   :  { %v916_v32 = vsel %vm915_vm3, %v913_v48, %v910_v58  ;;  %v947_v7 = vmul.f32 -0.5, %v1634_v28  ;;  %v1166_v29 = vadd.s32 4294967288, %v2836_v24  ;;  %v750_v50 = vadd.f32 1.0, %v749_v38 }
 0x1fb   :  { %1148 = vperm.xlu0 %1487, %v997_v18   ;;  %v1636_v60 = vpop.eup %1635  ;;  %v996_v53 = vsub.f32 %v436_v40, %v916_v32  ;;  %1643 = vlog2.f32 %v944_v54  ;;  %v752_v46 = vand.u32 2147483647, %v1630_v56  ;;  %v418_v23 = vmin.f32 %v2479_v36, 0.0 }
 0x1fc   :  { %v937_v11 = vmul.f32 0.6931472, %v1636_v60  ;;  %v948_v51 = vadd.f32 1.0, %v947_v7  ;;  %v2569_v20 = vsub.s32 %v1166_v29, %v2837_v16  ;;  %v950_v19 = vand.u32 2147483647, %v1634_v28 }
 0x1fd   :  { %1145 = vperm.xlu1 %1486, %v996_v53   ;;  %v2573_v10 = vsub.s32 %v2836_v24, %v2837_v16  ;;  %v1173_v61 = vadd.s32 4294967280, %v2836_v24  ;;  %v751_v25 = vmul.f32 %v1630_v56, %v750_v50  ;;  %v440_v34 = vmin.f32 %v2485_v2, 0.0 }
 0x1fe   :  { %v1638_v6 = vpop.eup %1637  ;;  %v943_v9 = vsel %vm942_vm4, %v940_v47, %v937_v11  ;;  %vm753_vm5 = vcmp.lt.f32.partialorder %v752_v46, 0.0004427343  ;;  %vm1171_vm6 = vcmask 130112   ;;  %v1180_v55 = vadd.s32 4294967272, %v2836_v24 }
 0x1ff   :  { %v999_v8 = vsub.f32 %v439_v5, %v943_v9  ;;  %v926_v21 = vadd.f32 1.0, %v1638_v6  ;;  %v929_v52 = vmul.f32 -0.5, %v1638_v6  ;;  %v949_v26 = vmul.f32 %v1634_v28, %v948_v51 }
 0x200   :  { %vm951_vm7 = vcmp.lt.f32.partialorder %v950_v19, 0.0004427343  ;;  %v2581_v2 = vsub.s32 %v1173_v61, %v2837_v16  ;;  %v932_v0 = vand.u32 2147483647, %v1638_v6  ;;  %vm1178_vm8 = vcmask 195712  }
 0x201   :  { %1154 = vperm.xlu0 %1487, %v999_v8   ;;  %1645 = vlog2.f32 %v926_v21  ;;  %v1640_v59 = vpop.eup %1639  ;;  %v930_v33 = vadd.f32 1.0, %v929_v52  ;;  %v2586_v56 = vsub.s32 %v1180_v55, %v2837_v16  ;;  %v438_v40 = vmin.f32 %v2521_v1, 0.0 }
 0x202   :  { %v953_v15 = vadd.f32 1.0, %v1640_v59  ;;  %v956_v63 = vmul.f32 -0.5, %v1640_v59  ;;  %vm933_vm9 = vcmp.lt.f32.partialorder %v932_v0, 0.0004427343  ;;  %v959_v12 = vand.u32 2147483647, %v1640_v59 }
 0x203   :  { %v1642_v22 = vpop.eup %1641  ;;  %v931_v42 = vmul.f32 %v1638_v6, %v930_v33  ;;  %vm1185_vm10 = vcmask 261312   ;;  %v441_v53 = vmin.f32 %v2535_v4, 0.0  ;;  %vm1192_vm12 = vcmask 326912  }
 0x204   :  { %v748_v3 = vmul.f32 0.6931472, %v1642_v22  ;;  %1647 = vlog2.f32 %v953_v15  ;;  %v957_v18 = vadd.f32 1.0, %v956_v63  ;;  %vm960_vm11 = vcmp.lt.f32.partialorder %v959_v12, 0.0004427343 }
 0x205   :  { %v1644_v62 = vpop.eup %1643  ;;  %v1047_v36 = vpop.permute.xlu0 %1046  ;;  %vm1362_vm13 = vcmask 1041409   ;;  %vm1364_vm14 = vcmask 1042434   ;;  %vm1366_vm15 = vcmask 1043459   ;;  %vm1368_vm0 = vcmask 1044484  }
 0x206   :  { %v754_v31 = vsel %vm753_vm5, %v751_v25, %v748_v3  ;;  %v946_v30 = vmul.f32 0.6931472, %v1644_v62  ;;  %v1044_v57 = vpop.permute.xlu1 %1043  ;;  %v1170_v13 = vrot.slane %v1047_v36, %v2569_v20  ;;  %v958_v60 = vmul.f32 %v1640_v59, %v957_v18 }
 0x207   :  { %v978_v17 = vsub.f32 %v418_v23, %v754_v31  ;;  %v1165_v14 = vrot.slane %v1044_v57, %v2573_v10  ;;  %vm1370_vm1 = vcmask 1045509   ;;  %vm1372_vm2 = vcmask 1046534  }
 0x208   :  { %v952_v45 = vsel %vm951_vm7, %v949_v26, %v946_v30  ;;  %v1187_v26 = vadd.s32 4294967264, %v2836_v24  ;;  %vm1374_vm3 = vcmask 1047559   ;;  %vm1377_vm4 = vcmask 326656  }
 0x209   :  { %1091 = vperm.xlu1 %1486, %v978_v17   ;;  %v1000_v43 = vsub.f32 %v440_v34, %v952_v45  ;;  %v1172_v41 = vsel %vm1171_vm6, %v1170_v13, %v1165_v14  ;;  %vm1388_vm5 = vcmask 57344  }
 0x20a   :  { %v2615_v13 = vsub.s32 %v1187_v26, %v2837_v16 }
 0x20b   :  { %v1050_v37 = vpop.permute.xlu1 %1049  ;;  %v1646_v39 = vpop.eup %1645  ;;  %1157 = vperm.xlu0 %1487, %v1000_v43  }
 0x20c   :  { %v1177_v35 = vrot.slane %v1050_v37, %v2581_v2  ;;  %v928_v27 = vmul.f32 0.6931472, %v1646_v39  ;;  %v1056_v38 = vpop.permute.xlu0 %1055 }
 0x20d   :  { %v1191_v63 = vrot.slane %v1056_v38, %v2615_v13 }
 0x20e   :  { %v1179_v28 = vsel %vm1178_vm8, %v1177_v35, %v1172_v41  ;;  %v934_v58 = vsel %vm933_vm9, %v931_v42, %v928_v27  ;;  %v1648_v49 = vpop.eup %1647 }
 0x20f   :  { %v1053_v48 = vpop.permute.xlu1 %1052  ;;  %v998_v44 = vsub.f32 %v438_v40, %v934_v58  ;;  %v955_v32 = vmul.f32 0.6931472, %v1648_v49 }
 0x210   :  { %v1184_v54 = vrot.slane %v1053_v48, %v2586_v56  ;;  %v1107_v6 = vpop.permute.xlu0 %1106 }
 0x211   :  { %1151 = vperm.xlu1 %1486, %v998_v44   ;;  %v961_v1 = vsel %vm960_vm11, %v958_v60, %v955_v32  ;;  %v1273_v0 = vrot.slane %v1107_v6, %v2569_v20 }
 0x212   :  { %v1186_v11 = vsel %vm1185_vm10, %v1184_v54, %v1179_v28  ;;  %v1001_v47 = vsub.f32 %v441_v53, %v961_v1 }
 0x213   :  { %v1193_v41 = vsel %vm1192_vm12, %v1191_v63, %v1186_v11 }
 0x214   :  { %v1104_v5 = vpop.permute.xlu1 %1103 }
 0x215   :  { %1160 = vperm.xlu1 %1486, %v1001_v47   ;;  %v1062_v7 = vpop.permute.xlu0 %1061  ;;  %v1269_v45 = vrot.slane %v1104_v5, %v2573_v10 }
 0x216   :  { %v1201_v43 = vrot.slane %v1062_v7, %v2569_v20 }
 0x217   :  { %v1274_v37 = vsel %vm1171_vm6, %v1273_v0, %v1269_v45 }
 0x219   :  { %v2593_v9 = vpop.permute.xlu1 %1109  ;;  %v1074_v8 = vpop.permute.xlu0 %1073 }
 0x21a   :  { %v1278_v18 = vrot.slane %v2593_v9, %v2581_v2  ;;  %v1221_v28 = vrot.slane %v1074_v8, %v2573_v10 }
 0x21c   :  { %v1279_v9 = vsel %vm1178_vm8, %v1278_v18, %v1274_v37 }
 0x225   :  { %v2595_v29 = vpop.permute.xlu1 %1112 }
 0x226   :  { %v1283_v49 = vrot.slane %v2595_v29, %v2586_v56 }
 0x228   :  { %v1068_v50 = vpop.permute.xlu0 %1067 }
 0x229   :  { %v1211_v40 = vrot.slane %v1068_v50, %v2586_v56 }
 0x22a   :  { %v2597_v21 = vpop.permute.xlu1 %1115 }
 0x22b   :  { %v1288_v32 = vrot.slane %v2597_v21, %v2615_v13 }
 0x22e   :  { %v1059_v46 = vpop.permute.xlu1 %1058 }
 0x22f   :  { %v1071_v4 = vpop.permute.xlu0 %1070  ;;  %v1197_v14 = vrot.slane %v1059_v46, %v2573_v10 }
 0x230   :  { %v1216_v60 = vrot.slane %v1071_v4, %v2615_v13 }
 0x231   :  { %v1202_v16 = vsel %vm1171_vm6, %v1201_v43, %v1197_v14 }
 0x233   :  { %v1119_v23 = vpop.permute.xlu0 %1118 }
 0x234   :  { %v1293_v58 = vrot.slane %v1119_v23, %v2573_v10  ;;  %v1284_v23 = vsel %vm1185_vm10, %v1283_v49, %v1279_v9 }
 0x237   :  { %v1065_v59 = vpop.permute.xlu1 %1064 }
 0x238   :  { %v1206_v33 = vrot.slane %v1065_v59, %v2581_v2 }
 0x23a   :  { %v1207_v39 = vsel %vm1178_vm8, %v1206_v33, %v1202_v16 }
 0x23b   :  { %v1212_v44 = vsel %vm1185_vm10, %v1211_v40, %v1207_v39 }
 0x23c   :  { %v1217_v7 = vsel %vm1192_vm12, %v1216_v60, %v1212_v44 }
 0x23d   :  { %v2599_v22 = vpop.permute.xlu0 %1124 }
 0x23e   :  { %v1302_v47 = vrot.slane %v2599_v22, %v2581_v2 }
 0x240   :  { %v1077_v51 = vpop.permute.xlu1 %1076 }
 0x241   :  { %v1225_v35 = vrot.slane %v1077_v51, %v2569_v20 }
 0x243   :  { %v2601_v15 = vpop.permute.xlu0 %1136  ;;  %v1226_v53 = vsel %vm1171_vm6, %v1225_v35, %v1221_v28 }
 0x249   :  { %v1080_v19 = vpop.permute.xlu1 %1079 }
 0x24a   :  { %v1230_v12 = vrot.slane %v1080_v19, %v2581_v2 }
 0x24c   :  { %v1231_v38 = vsel %vm1178_vm8, %v1230_v12, %v1226_v53 }
 0x24e   :  { %v2603_v3 = vpop.permute.xlu0 %1127 }
 0x24f   :  { %v1307_v51 = vrot.slane %v2603_v3, %v2586_v56 }
 0x252   :  { %v1083_v61 = vpop.permute.xlu1 %1082 }
 0x253   :  { %v2605_v34 = vpop.permute.xlu0 %1130  ;;  %v1235_v48 = vrot.slane %v1083_v61, %v2586_v56  ;;  %v1289_v61 = vsel %vm1192_vm12, %v1288_v32, %v1284_v23 }
 0x254   :  { %v1312_v14 = vrot.slane %v2605_v34, %v2615_v13 }
 0x255   :  { %v1236_v29 = vsel %vm1185_vm10, %v1235_v48, %v1231_v38 }
 0x259   :  { %v1086_v25 = vpop.permute.xlu1 %1085 }
 0x25a   :  { %v1089_v62 = vpop.permute.xlu0 %1088  ;;  %v1240_v54 = vrot.slane %v1086_v25, %v2615_v13  ;;  %v1363_v25 = vsel %vm1362_vm13, %v1217_v7, %v1193_v41 }
 0x25b   :  { %v1245_v5 = vrot.slane %v1089_v62, %v2573_v10 }
 0x25c   :  { %v1241_v50 = vsel %vm1192_vm12, %v1240_v54, %v1236_v29 }
 0x25d   :  { %v1122_v52 = vpop.permute.xlu1 %1121 }
 0x25e   :  { %v1297_v27 = vrot.slane %v1122_v52, %v2569_v20 }
 0x260   :  { %v1298_v11 = vsel %vm1171_vm6, %v1297_v27, %v1293_v58 }
 0x261   :  { %v1303_v46 = vsel %vm1178_vm8, %v1302_v47, %v1298_v11 }
 0x262   :  { %v1095_v55 = vpop.permute.xlu0 %1094 }
 0x263   :  { %v1254_v8 = vrot.slane %v1095_v55, %v2581_v2  ;;  %v1365_v55 = vsel %vm1364_vm14, %v1241_v50, %v1363_v25 }
 0x26c   :  { %v2607_v36 = vpop.permute.xlu1 %1133 }
 0x26d   :  { %v1317_v52 = vrot.slane %v2607_v36, %v2573_v10 }
 0x26e   :  { %v1098_v30 = vpop.permute.xlu0 %1097 }
 0x26f   :  { %v1259_v4 = vrot.slane %v1098_v30, %v2586_v56  ;;  %v1308_v30 = vsel %vm1185_vm10, %v1307_v51, %v1303_v46 }
 0x270   :  { %v1313_v34 = vsel %vm1192_vm12, %v1312_v14, %v1308_v30 }
 0x272   :  { %v2609_v31 = vpop.permute.xlu1 %1139 }
 0x273   :  { %v1326_v3 = vrot.slane %v2609_v31, %v2581_v2 }
 0x275   :  { %v1101_v17 = vpop.permute.xlu0 %1100 }
 0x276   :  { %v1264_v22 = vrot.slane %v1101_v17, %v2615_v13  ;;  %v1321_v17 = vrot.slane %v2601_v15, %v2569_v20 }
 0x278   :  { %v2612_v57 = vpop.permute.xlu1 %1142  ;;  %v1322_v0 = vsel %vm1171_vm6, %v1321_v17, %v1317_v52 }
 0x279   :  { %v1331_v36 = vrot.slane %v2612_v57, %v2586_v56  ;;  %v1327_v57 = vsel %vm1178_vm8, %v1326_v3, %v1322_v0 }
 0x27a   :  { %v2631_v42 = vpop.permute.xlu0 %1148 }
 0x27b   :  { %v1341_v15 = vrot.slane %v2631_v42, %v2573_v10 }
 0x27c   :  { %v2623_v24 = vpop.permute.xlu1 %1145 }
 0x27d   :  { %v1336_v33 = vrot.slane %v2623_v24, %v2615_v13  ;;  %v1332_v24 = vsel %vm1185_vm10, %v1331_v36, %v1327_v57 }
 0x27f   :  { %v1337_v27 = vsel %vm1192_vm12, %v1336_v33, %v1332_v24 }
 0x280   :  { %v1155_v21 = vpop.permute.xlu0 %1154 }
 0x281   :  { %v1350_v16 = vrot.slane %v1155_v21, %v2581_v2 }
 0x288   :  { %v1092_v1 = vpop.permute.xlu1 %1091 }
 0x289   :  { %v1249_v6 = vrot.slane %v1092_v1, %v2569_v20 }
 0x28a   :  { %v1158_v63 = vpop.permute.xlu0 %1157 }
 0x28b   :  { %v1250_v59 = vsel %vm1171_vm6, %v1249_v6, %v1245_v5  ;;  %v1355_v39 = vrot.slane %v1158_v63, %v2586_v56 }
 0x28c   :  { %v1255_v19 = vsel %vm1178_vm8, %v1254_v8, %v1250_v59 }
 0x28d   :  { %v1260_v62 = vsel %vm1185_vm10, %v1259_v4, %v1255_v19 }
 0x28e   :  { %v1265_v26 = vsel %vm1192_vm12, %v1264_v22, %v1260_v62 }
 0x28f   :  { %v1367_v45 = vsel %vm1366_vm15, %v1265_v26, %v1365_v55 }
 0x290   :  { %v1152_v43 = vpop.permute.xlu1 %1151  ;;  %v1369_v31 = vsel %vm1368_vm0, %v1289_v61, %v1367_v45 }
 0x291   :  { %v1345_v41 = vrot.slane %v1152_v43, %v2569_v20  ;;  %v1371_v37 = vsel %vm1370_vm1, %v1313_v34, %v1369_v31 }
 0x292   :  { %v1373_v12 = vsel %vm1372_vm2, %v1337_v27, %v1371_v37 }
 0x293   :  { %v1346_v35 = vsel %vm1171_vm6, %v1345_v41, %v1341_v15 }
 0x294   :  { %v1351_v42 = vsel %vm1178_vm8, %v1350_v16, %v1346_v35  ;;  %v1161_v20 = vpop.permute.xlu1 %1160 }
 0x295   :  { %v1360_v18 = vrot.slane %v1161_v20, %v2615_v13  ;;  %v1356_v40 = vsel %vm1185_vm10, %v1355_v39, %v1351_v42 }
 0x297   :  { %v1361_v2 = vsel %vm1192_vm12, %v1360_v18, %v1356_v40 }
 0x298   :  { %v1375_v28 = vsel %vm1374_vm3, %v1361_v2, %v1373_v12 }
 0x299   :  { %v1378_v58 = vsel %vm1377_vm4, %v1375_v28, 0.0 }
 0x29a   :  { %1379 = vadd.xlane.f32.xlu0 %v1378_v58 }
 0x327   :  { %v1380_v56 = vpop.xlane.xlu0 %1379 }
 0x328   :  { %v1381_v48 = vsub.f32 0.0, %v1380_v56 }
 0x32a   :  { %v1386_v49 = vrot.slane %v1381_v48, %v2573_v10 }
 0x32c   :  { %1389 = vst.msk [vmem:[#allocation9] sm:$0x1] %vm1388_vm5, %v1386_v49 }
 0x32d   :  { %1728 = shalt.err (!%p1725_p12)
}
 0x32e   :  { %s1729_s26 = scalar_lea.hbm %s2719_s4, 16 }
 0x32f   :  { %p1730_p13 = scmp.ne.s32.totalorder %s2719_s4, %s1729_s26  ;;  %p1733_p0 = scmp.lt.u32.totalorder %s1729_s26, %s2719_s4 }
 0x331   :  { %p1735_p1 = pnand %p1733_p0, %p1730_p13 }
 0x333   :  { %1738 = shalt.err (!%p1735_p1)
}
 0x334   :  { %1399 = dma.vmem_to_hbm [thread:$0]  %s1397_s3, 16, %s2719_s4, [#allocation10]  }
 0x335   :  { %1761 = dma.done.wait [#allocation10], 16  }
 0x336   :  { %1762 = vsyncadd [#allocation10], 4294967280 }
 0x337   :  { %1403 = vsyncpa [#allocation10], 1 }
 0x338   :  { %1404 = vsyncmov [#allocation4] }
 0x33b   :  { %s1405_s7 = vpop.sfrf %1404 }
 0x33c   :  { %p1446_p2 = scmp.ne.s32.totalorder %s1405_s7, 0 }
 0x33e   :  { %1409 = shalt.err (%p1446_p2)  }
 0x33f   :  { %1410 = vsyncmov [#allocation5] }
 0x342   :  { %s1411_s8 = vpop.sfrf %1410 }
 0x343   :  { %p1447_p3 = scmp.ne.s32.totalorder %s1411_s8, 0 }
 0x345   :  { %1415 = shalt.err (%p1447_p3)  }

</bundles_post_ra>
